<compile_context>
chip_gen: v6e
topology: v6e:2x2x1
jax: 0.10.0
libtpu: 0.0.40
codegen_flags: <defaults>
</compile_context>

<pallas_src>
import functools

import jax
import jax.numpy as jnp
from jax.experimental import pallas as pl
from jax.experimental.pallas import tpu as pltpu


def _round_up(x, m):
    return (x + m - 1) // m * m


def _detect_vmem_limit():
    # Generation-aware scoped-VMEM cap: ~3/4 of physical, capped at 100 MiB.
    #   v7x : 64 MiB physical -> 48 MiB limit
    #   v5e / v6e: 128 MiB physical -> 96 MiB limit
    cap = 64 * 1024 * 1024
    try:
        info = pltpu.get_tpu_info()
        cap = int(getattr(info, "vmem_capacity_bytes", cap) or cap)
    except Exception:
        pass
    return min(cap * 3 // 4, 100 * 1024 * 1024)


_VMEM_LIMIT = _detect_vmem_limit()


def _pad2d(a, rows, cols):
    r, c = a.shape
    return jnp.pad(a, ((0, rows - r), (0, cols - c)))


def _row_tile(n_pad, *, bytes_per_row):
    """Largest row tile (<=512) dividing n_pad.  Prefers an even block count
    (>=2) so the 'parallel' row axis shards evenly across both v7x TensorCores,
    and requires the double-buffered row slab to fit within ~half the VMEM
    budget (leaving room for the resident H / W / output tiles)."""
    assert n_pad % 128 == 0, n_pad
    candidates = [t for t in (512, 256, 128) if n_pad % t == 0]

    def fits(t):
        return 2 * t * bytes_per_row <= _VMEM_LIMIT // 2

    even = [t for t in candidates
            if (n_pad // t) >= 2 and (n_pad // t) % 2 == 0 and fits(t)]
    if even:
        return even[0]
    ok = [t for t in candidates if fits(t)]
    if ok:
        return ok[0]
    # TODO(synk): for extremely large N (dense A slab > VMEM even at tm=128)
    # fall back to a K-tiled accumulator variant.
    return candidates[-1]


# ---------------------------------------------------------------------------
# Kernel 1: feature transform  H1 = X @ W1   (row-tiled, W resident, bf16 out)
# ---------------------------------------------------------------------------
def _feature_transform_kernel(x_ref, w_ref, o_ref):
    o_ref[...] = jnp.dot(
        x_ref[...], w_ref[...], preferred_element_type=jnp.float32
    ).astype(o_ref.dtype)


def feature_transform(x, w, *, out_dtype=jnp.bfloat16):
    n, f_in = x.shape
    f_out = w.shape[1]
    tm = _row_tile(n, bytes_per_row=f_in * x.dtype.itemsize)
    return pl.pallas_call(
        _feature_transform_kernel,
        out_shape=jax.ShapeDtypeStruct((n, f_out), out_dtype),
        grid_spec=pl.GridSpec(
            grid=(n // tm,),
            in_specs=[
                pl.BlockSpec((tm, f_in), lambda i: (i, 0)),      # X row tile
                pl.BlockSpec((f_in, f_out), lambda i: (0, 0)),   # W resident
            ],
            out_specs=pl.BlockSpec((tm, f_out), lambda i: (i, 0)),
        ),
        compiler_params=pltpu.CompilerParams(
            dimension_semantics=("parallel",),
            vmem_limit_bytes=_VMEM_LIMIT,
        ),
    )(x, w)


# ---------------------------------------------------------------------------
# Kernel 2 (fused): H2 = relu(A_hat @ H1 + b1).astype(bf16) @ W2
#   A_hat streams as (tm, N) row slabs; H1, b1, W2 are VMEM-resident.
#   Whole contraction in one dot per row tile (no K grid axis, no scratch).
# ---------------------------------------------------------------------------
def _agg_relu_transform_kernel(a_ref, h_ref, b1_ref, w2_ref, o_ref):
    z = jnp.dot(a_ref[...], h_ref[...], preferred_element_type=jnp.float32)
    r = jnp.maximum(z + b1_ref[...], 0.0).astype(w2_ref.dtype)
    o_ref[...] = jnp.dot(
        r, w2_ref[...], preferred_element_type=jnp.float32
    ).astype(o_ref.dtype)


def fused_agg_relu_transform(a_hat, h1, b1, w2, *, out_dtype=jnp.bfloat16):
    n = a_hat.shape[0]
    f_hid = h1.shape[1]
    f_out = w2.shape[1]
    tm = _row_tile(n, bytes_per_row=n * a_hat.dtype.itemsize)
    return pl.pallas_call(
        _agg_relu_transform_kernel,
        out_shape=jax.ShapeDtypeStruct((n, f_out), out_dtype),
        grid_spec=pl.GridSpec(
            grid=(n // tm,),
            in_specs=[
                pl.BlockSpec((tm, n), lambda i: (i, 0)),         # A row slab
                pl.BlockSpec((n, f_hid), lambda i: (0, 0)),      # H1 resident
                pl.BlockSpec((1, f_hid), lambda i: (0, 0)),      # b1 resident
                pl.BlockSpec((f_hid, f_out), lambda i: (0, 0)),  # W2 resident
            ],
            out_specs=pl.BlockSpec((tm, f_out), lambda i: (i, 0)),
        ),
        compiler_params=pltpu.CompilerParams(
            dimension_semantics=("parallel",),
            vmem_limit_bytes=_VMEM_LIMIT,
        ),
    )(a_hat, h1, b1.reshape(1, f_hid), w2)


# ---------------------------------------------------------------------------
# Kernel 3: final aggregation  out = A_hat @ H2 + b2   (f32 output)
# ---------------------------------------------------------------------------
def _agg_bias_kernel(a_ref, h_ref, b_ref, o_ref):
    z = jnp.dot(a_ref[...], h_ref[...], preferred_element_type=jnp.float32)
    o_ref[...] = (z + b_ref[...]).astype(o_ref.dtype)


def aggregate_bias(a_hat, h, b, *, out_dtype=jnp.float32):
    n = a_hat.shape[0]
    f_out = h.shape[1]
    tm = _row_tile(n, bytes_per_row=n * a_hat.dtype.itemsize)
    return pl.pallas_call(
        _agg_bias_kernel,
        out_shape=jax.ShapeDtypeStruct((n, f_out), out_dtype),
        grid_spec=pl.GridSpec(
            grid=(n // tm,),
            in_specs=[
                pl.BlockSpec((tm, n), lambda i: (i, 0)),       # A row slab
                pl.BlockSpec((n, f_out), lambda i: (0, 0)),    # H resident
                pl.BlockSpec((1, f_out), lambda i: (0, 0)),    # bias resident
            ],
            out_specs=pl.BlockSpec((tm, f_out), lambda i: (i, 0)),
        ),
        compiler_params=pltpu.CompilerParams(
            dimension_semantics=("parallel",),
            vmem_limit_bytes=_VMEM_LIMIT,
        ),
    )(a_hat, h, b.reshape(1, f_out))


# ---------------------------------------------------------------------------
# One-time (hoisted) preprocessing + the jittable forward.
# ---------------------------------------------------------------------------
def prepare_graph(a_hat, n_pad):
    """Pad + bf16-cast the dense normalized adjacency ONCE (not per call)."""
    return _pad2d(a_hat, n_pad, n_pad).astype(jnp.bfloat16)


def prepare_params(params):
    """Pad + cast weights/biases ONCE (not per call)."""
    w1, b1, w2, b2 = params
    f_in, hidden = w1.shape
    n_cls = w2.shape[1]
    fi_pad = _round_up(f_in, 128)
    fh_pad = _round_up(hidden, 128)
    fc_pad = _round_up(n_cls, 128)
    bf = jnp.bfloat16
    return (
        _pad2d(w1, fi_pad, fh_pad).astype(bf),
        jnp.pad(b1, (0, fh_pad - hidden)).astype(jnp.float32),
        _pad2d(w2, fh_pad, fc_pad).astype(bf),
        jnp.pad(b2, (0, fc_pad - n_cls)).astype(jnp.float32),
    )


def gcn_forward(x, a_p, padded_params, *, num_classes):
    """2-layer GCN forward (inference) on pre-padded A_hat and parameters."""
    w1_p, b1_p, w2_p, b2_p = padded_params
    n = x.shape[0]
    n_pad = a_p.shape[0]
    fi_pad = w1_p.shape[0]
    x_p = _pad2d(x, n_pad, fi_pad).astype(jnp.bfloat16)

    h1 = feature_transform(x_p, w1_p)                    # bf16 (n_pad, fh_pad)
    # conv1 aggregation + bias + ReLU fused with conv2's feature transform.
    # F.dropout(p=0.5, training=self.training) is identity at inference time.
    # TODO(synk): training-mode stochastic dropout mask not implemented.
    h2 = fused_agg_relu_transform(a_p, h1, b1_p, w2_p)   # bf16 (n_pad, fc_pad)
    out = aggregate_bias(a_p, h2, b2_p)                  # f32  (n_pad, fc_pad)
    return out[:n, :num_classes]


# ---------------------------------------------------------------------------
# Plain-JAX glue: normalized adjacency, init, and a cast-matched reference.
# ---------------------------------------------------------------------------
def build_a_hat(edge_index, num_nodes):
    """Dense D^{-1/2}(A+I)D^{-1/2} from COO edge_index = (src, dst).

    Matches PyG gcn_norm semantics: duplicate edges sum their weights, and a
    self-loop of weight 1 is added only to nodes that lack one.
    """
    src, dst = edge_index
    a = jnp.zeros((num_nodes, num_nodes), jnp.float32).at[dst, src].add(1.0)
    diag = jnp.diagonal(a)
    a = a + jnp.diag(jnp.where(diag == 0, 1.0, 0.0))
    deg = a.sum(axis=1)
    dinv_sqrt = jnp.where(deg > 0, 1.0 / jnp.sqrt(deg), 0.0)
    return dinv_sqrt[:, None] * a * dinv_sqrt[None, :]


def glorot(key, fan_in, fan_out):
    limit = jnp.sqrt(6.0 / (fan_in + fan_out))
    return jax.random.uniform(key, (fan_in, fan_out), jnp.float32, -limit, limit)


def ref_forward(x, a_hat, params):
    """Plain-JAX reference using the same bf16-operand / f32-accum casting."""
    bf = jnp.bfloat16
    w1, b1, w2, b2 = params
    a_bf = a_hat.astype(bf)
    h1 = jnp.dot(x.astype(bf), w1.astype(bf),
                 preferred_element_type=jnp.float32).astype(bf)
    z1 = jnp.dot(a_bf, h1, preferred_element_type=jnp.float32) + b1
    r1 = jnp.maximum(z1, 0.0)
    h2 = jnp.dot(r1.astype(bf), w2.astype(bf),
                 preferred_element_type=jnp.float32).astype(bf)
    return jnp.dot(a_bf, h2, preferred_element_type=jnp.float32) + b2


if __name__ == "__main__":
    # Small synthetic "Cora-like" graph.
    N = 128            # nodes
    NUM_FEATURES = 64  # dataset.num_features (synthetic, small)
    HIDDEN = 32        # hidden_channels
    NUM_CLASSES = 8    # dataset.num_classes (synthetic, small)
    NUM_EDGES = 512

    key = jax.random.PRNGKey(0)
    k_x, k_src, k_dst, k_w1, k_w2 = jax.random.split(key, 5)

    x = jax.random.normal(k_x, (N, NUM_FEATURES), jnp.float32)
    src = jax.random.randint(k_src, (NUM_EDGES,), 0, N)
    dst = jax.random.randint(k_dst, (NUM_EDGES,), 0, N)
    a_hat = build_a_hat((src, dst), N)

    # Deterministic parameter init (glorot weights, zero bias — as PyG GCNConv).
    w1 = glorot(k_w1, NUM_FEATURES, HIDDEN)
    b1 = jnp.zeros((HIDDEN,), jnp.float32)
    w2 = glorot(k_w2, HIDDEN, NUM_CLASSES)
    b2 = jnp.zeros((NUM_CLASSES,), jnp.float32)
    params = (w1, b1, w2, b2)

    # One-time (hoisted) graph / parameter padding + bf16 casts.
    n_pad = _round_up(max(N, 512), 512)
    a_p = prepare_graph(a_hat, n_pad)
    padded_params = prepare_params(params)

    fwd = jax.jit(functools.partial(gcn_forward, num_classes=NUM_CLASSES))
    out = jax.block_until_ready(fwd(x, a_p, padded_params))

    assert out.shape == (N, NUM_CLASSES), out.shape
    assert bool(jnp.all(jnp.isfinite(out)))

    # Cross-check against a cast-matched plain-JAX reference.
    ref = ref_forward(x, a_hat, params)
    max_err = float(jnp.max(jnp.abs(out - ref)))
    assert bool(jnp.allclose(out, ref, atol=2e-2, rtol=2e-2)), max_err

    print("KERNEL_OK")
</pallas_src>

<mosaic_0001>
module attributes {stable_mosaic.version = 11 : i64} {
  func.func @_feature_transform_kernel(%arg0: i32, %arg1: memref<256x128xbf16, #tpu.memory_space<vmem>>, %arg2: memref<128x128xbf16, #tpu.memory_space<vmem>>, %arg3: memref<256x128xbf16, #tpu.memory_space<vmem>>) attributes {dimension_semantics = [#tpu.dimension_semantics<parallel>], iteration_bounds = array<i64: 2>, scalar_prefetch = 0 : i64, scratch_operands = 0 : i64, tpu.core_type = #tpu.core_type<tc>, window_params = [{transform_indices = @transform_0, window_bounds = array<i64: 256, 128>}, {pipeline_mode = #tpu.pipeline_mode<synchronous>, transform_indices = @transform_1, window_bounds = array<i64: 128, 128>}, {transform_indices = @transform_2, window_bounds = array<i64: 256, 128>}]} {
    %c0 = arith.constant 0 : index
    %c0_0 = arith.constant 0 : index
    %0 = vector.load %arg1[%c0, %c0_0] : memref<256x128xbf16, #tpu.memory_space<vmem>>, vector<256x128xbf16>
    %c0_1 = arith.constant 0 : index
    %c0_2 = arith.constant 0 : index
    %1 = vector.load %arg2[%c0_1, %c0_2] : memref<128x128xbf16, #tpu.memory_space<vmem>>, vector<128x128xbf16>
    %cst = arith.constant dense<0.000000e+00> : vector<256x128xf32>
    %2 = tpu.matmul %0, %1, %cst {dimension_numbers = #tpu.dot_dimension_numbers<[1], [0], [0], [1], [0, 0, 1, 1], [], []>} : vector<256x128xbf16>, vector<128x128xbf16>, vector<256x128xf32> -> vector<256x128xf32>
    %3 = arith.truncf %2 : vector<256x128xf32> to vector<256x128xbf16>
    %c0_3 = arith.constant 0 : index
    %c0_4 = arith.constant 0 : index
    %4 = vector.load %arg3[%c0_3, %c0_4] : memref<256x128xbf16, #tpu.memory_space<vmem>>, vector<256x128xbf16>
    tpu.vector_store %arg3[%c0_3, %c0_4], %3 {strides = array<i32>} : memref<256x128xbf16, #tpu.memory_space<vmem>>, vector<256x128xbf16>,
    return
  }
  func.func @transform_0(%arg0: i32) -> (i32, i32) {
    %c0_i32 = arith.constant 0 : i32
    %c0_i32_0 = arith.constant 0 : i32
    return %arg0, %c0_i32 : i32, i32
  }
  func.func @transform_1(%arg0: i32) -> (i32, i32) {
    %c0_i32 = arith.constant 0 : i32
    %c0_i32_0 = arith.constant 0 : i32
    %c0_i32_1 = arith.constant 0 : i32
    return %c0_i32, %c0_i32_0 : i32, i32
  }
  func.func @transform_2(%arg0: i32) -> (i32, i32) {
    %c0_i32 = arith.constant 0 : i32
    %c0_i32_0 = arith.constant 0 : i32
    return %arg0, %c0_i32 : i32, i32
  }
}

module attributes {stable_mosaic.version = 11 : i64} {
  func.func @_agg_relu_transform_kernel(%arg0: i32, %arg1: memref<256x512xbf16, #tpu.memory_space<vmem>>, %arg2: memref<512x128xbf16, #tpu.memory_space<vmem>>, %arg3: memref<1x128xf32, #tpu.memory_space<vmem>>, %arg4: memref<128x128xbf16, #tpu.memory_space<vmem>>, %arg5: memref<256x128xbf16, #tpu.memory_space<vmem>>) attributes {dimension_semantics = [#tpu.dimension_semantics<parallel>], iteration_bounds = array<i64: 2>, scalar_prefetch = 0 : i64, scratch_operands = 0 : i64, tpu.core_type = #tpu.core_type<tc>, window_params = [{transform_indices = @transform_0, window_bounds = array<i64: 256, 512>}, {pipeline_mode = #tpu.pipeline_mode<synchronous>, transform_indices = @transform_1, window_bounds = array<i64: 512, 128>}, {pipeline_mode = #tpu.pipeline_mode<synchronous>, transform_indices = @transform_2, window_bounds = array<i64: 1, 128>}, {pipeline_mode = #tpu.pipeline_mode<synchronous>, transform_indices = @transform_3, window_bounds = array<i64: 128, 128>}, {transform_indices = @transform_4, window_bounds = array<i64: 256, 128>}]} {
    %c0 = arith.constant 0 : index
    %c0_0 = arith.constant 0 : index
    %0 = vector.load %arg1[%c0, %c0_0] : memref<256x512xbf16, #tpu.memory_space<vmem>>, vector<256x512xbf16>
    %c0_1 = arith.constant 0 : index
    %c0_2 = arith.constant 0 : index
    %1 = vector.load %arg2[%c0_1, %c0_2] : memref<512x128xbf16, #tpu.memory_space<vmem>>, vector<512x128xbf16>
    %cst = arith.constant dense<0.000000e+00> : vector<256x128xf32>
    %2 = tpu.matmul %0, %1, %cst {dimension_numbers = #tpu.dot_dimension_numbers<[1], [0], [0], [1], [0, 0, 1, 1], [], []>} : vector<256x512xbf16>, vector<512x128xbf16>, vector<256x128xf32> -> vector<256x128xf32>
    %c0_3 = arith.constant 0 : index
    %c0_4 = arith.constant 0 : index
    %3 = vector.load %arg3[%c0_3, %c0_4] : memref<1x128xf32, #tpu.memory_space<vmem>>, vector<1x128xf32>
    %4 = vector.broadcast %3 : vector<1x128xf32> to vector<256x128xf32>
    %5 = arith.addf %2, %4 : vector<256x128xf32>
    %cst_5 = arith.constant 0.000000e+00 : f32
    %6 = vector.broadcast %cst_5 : f32 to vector<256x128xf32>
    %7 = arith.maximumf %5, %6 : vector<256x128xf32>
    %8 = arith.truncf %7 : vector<256x128xf32> to vector<256x128xbf16>
    %c0_6 = arith.constant 0 : index
    %c0_7 = arith.constant 0 : index
    %9 = vector.load %arg4[%c0_6, %c0_7] : memref<128x128xbf16, #tpu.memory_space<vmem>>, vector<128x128xbf16>
    %cst_8 = arith.constant dense<0.000000e+00> : vector<256x128xf32>
    %10 = tpu.matmul %8, %9, %cst_8 {dimension_numbers = #tpu.dot_dimension_numbers<[1], [0], [0], [1], [0, 0, 1, 1], [], []>} : vector<256x128xbf16>, vector<128x128xbf16>, vector<256x128xf32> -> vector<256x128xf32>
    %11 = arith.truncf %10 : vector<256x128xf32> to vector<256x128xbf16>
    %c0_9 = arith.constant 0 : index
    %c0_10 = arith.constant 0 : index
    %12 = vector.load %arg5[%c0_9, %c0_10] : memref<256x128xbf16, #tpu.memory_space<vmem>>, vector<256x128xbf16>
    tpu.vector_store %arg5[%c0_9, %c0_10], %11 {strides = array<i32>} : memref<256x128xbf16, #tpu.memory_space<vmem>>, vector<256x128xbf16>,
    return
  }
  func.func @transform_0(%arg0: i32) -> (i32, i32) {
    %c0_i32 = arith.constant 0 : i32
    %c0_i32_0 = arith.constant 0 : i32
    return %arg0, %c0_i32 : i32, i32
  }
  func.func @transform_1(%arg0: i32) -> (i32, i32) {
    %c0_i32 = arith.constant 0 : i32
    %c0_i32_0 = arith.constant 0 : i32
    %c0_i32_1 = arith.constant 0 : i32
    return %c0_i32, %c0_i32_0 : i32, i32
  }
  func.func @transform_2(%arg0: i32) -> (i32, i32) {
    %c0_i32 = arith.constant 0 : i32
    %c0_i32_0 = arith.constant 0 : i32
    %c0_i32_1 = arith.constant 0 : i32
    return %c0_i32, %c0_i32_0 : i32, i32
  }
  func.func @transform_3(%arg0: i32) -> (i32, i32) {
    %c0_i32 = arith.constant 0 : i32
    %c0_i32_0 = arith.constant 0 : i32
    %c0_i32_1 = arith.constant 0 : i32
    return %c0_i32, %c0_i32_0 : i32, i32
  }
  func.func @transform_4(%arg0: i32) -> (i32, i32) {
    %c0_i32 = arith.constant 0 : i32
    %c0_i32_0 = arith.constant 0 : i32
    return %arg0, %c0_i32 : i32, i32
  }
}

module attributes {stable_mosaic.version = 11 : i64} {
  func.func @_agg_bias_kernel(%arg0: i32, %arg1: memref<256x512xbf16, #tpu.memory_space<vmem>>, %arg2: memref<512x128xbf16, #tpu.memory_space<vmem>>, %arg3: memref<1x128xf32, #tpu.memory_space<vmem>>, %arg4: memref<256x128xf32, #tpu.memory_space<vmem>>) attributes {dimension_semantics = [#tpu.dimension_semantics<parallel>], iteration_bounds = array<i64: 2>, scalar_prefetch = 0 : i64, scratch_operands = 0 : i64, tpu.core_type = #tpu.core_type<tc>, window_params = [{transform_indices = @transform_0, window_bounds = array<i64: 256, 512>}, {pipeline_mode = #tpu.pipeline_mode<synchronous>, transform_indices = @transform_1, window_bounds = array<i64: 512, 128>}, {pipeline_mode = #tpu.pipeline_mode<synchronous>, transform_indices = @transform_2, window_bounds = array<i64: 1, 128>}, {transform_indices = @transform_3, window_bounds = array<i64: 256, 128>}]} {
    %c0 = arith.constant 0 : index
    %c0_0 = arith.constant 0 : index
    %0 = vector.load %arg1[%c0, %c0_0] : memref<256x512xbf16, #tpu.memory_space<vmem>>, vector<256x512xbf16>
    %c0_1 = arith.constant 0 : index
    %c0_2 = arith.constant 0 : index
    %1 = vector.load %arg2[%c0_1, %c0_2] : memref<512x128xbf16, #tpu.memory_space<vmem>>, vector<512x128xbf16>
    %cst = arith.constant dense<0.000000e+00> : vector<256x128xf32>
    %2 = tpu.matmul %0, %1, %cst {dimension_numbers = #tpu.dot_dimension_numbers<[1], [0], [0], [1], [0, 0, 1, 1], [], []>} : vector<256x512xbf16>, vector<512x128xbf16>, vector<256x128xf32> -> vector<256x128xf32>
    %c0_3 = arith.constant 0 : index
    %c0_4 = arith.constant 0 : index
    %3 = vector.load %arg3[%c0_3, %c0_4] : memref<1x128xf32, #tpu.memory_space<vmem>>, vector<1x128xf32>
    %4 = vector.broadcast %3 : vector<1x128xf32> to vector<256x128xf32>
    %5 = arith.addf %2, %4 : vector<256x128xf32>
    %c0_5 = arith.constant 0 : index
    %c0_6 = arith.constant 0 : index
    %6 = vector.load %arg4[%c0_5, %c0_6] : memref<256x128xf32, #tpu.memory_space<vmem>>, vector<256x128xf32>
    tpu.vector_store %arg4[%c0_5, %c0_6], %5 {strides = array<i32>} : memref<256x128xf32, #tpu.memory_space<vmem>>, vector<256x128xf32>,
    return
  }
  func.func @transform_0(%arg0: i32) -> (i32, i32) {
    %c0_i32 = arith.constant 0 : i32
    %c0_i32_0 = arith.constant 0 : i32
    return %arg0, %c0_i32 : i32, i32
  }
  func.func @transform_1(%arg0: i32) -> (i32, i32) {
    %c0_i32 = arith.constant 0 : i32
    %c0_i32_0 = arith.constant 0 : i32
    %c0_i32_1 = arith.constant 0 : i32
    return %c0_i32, %c0_i32_0 : i32, i32
  }
  func.func @transform_2(%arg0: i32) -> (i32, i32) {
    %c0_i32 = arith.constant 0 : i32
    %c0_i32_0 = arith.constant 0 : i32
    %c0_i32_1 = arith.constant 0 : i32
    return %c0_i32, %c0_i32_0 : i32, i32
  }
  func.func @transform_3(%arg0: i32) -> (i32, i32) {
    %c0_i32 = arith.constant 0 : i32
    %c0_i32_0 = arith.constant 0 : i32
    return %arg0, %c0_i32 : i32, i32
  }
}

</mosaic_0001>

<bundles_post_ra>
// kernel: gcn_forward.3
= control target key start
LH: loop header
LB: loop body
LE: loop exit
PB: predicated region body
PF: predicated region fallthrough
CT: control target
= control target key end

     0   :  { %7 = vsyncpa [#allocation3], 0  ;;  %s1129_s9 = smov 0   ;;  %s1210_s0 = inlined_call_operand.vmem [shape: bf16[512,128], index: 0, kind: input, shape index: {}]   ;;  %s1211_s1 = inlined_call_operand.hbm [shape: bf16[128,128], index: 1, kind: input, shape index: {}]   ;;  %s1212_s2 = inlined_call_operand.vmem [shape: bf16[512,128], index: 2, kind: output, shape index: {}]  }
   0x1 LB: > { %s744_s10 = sadd.s32 4294967295, %s1109_s9   ;;  %p746_p0 = scmp.ge.s32.totalorder %s1109_s9, 1  ;;  %s1109_s9 = sphi %s1129_s9, %s13_s9  }
   0x2   : > { %p91_p1 = scmp.lt.s32.totalorder %s1109_s9, 3  ;;  %s1111_s11 = smov [#allocation2]  }
   0x3   : > { %s103_s12 = sshll.u32 %s1111_s11, 4  ;;  %p1141_p3 = scmp.eq.s32.totalorder %s744_s10, 0  ;;  %s104_s12 = int_to_ptr.vmem [resolvable:$true] %s103_s12 }
   0x4   : > { %p1137_p2 = pnand %p746_p0, %p91_p1  ;;  %s1084_s15 = scalar_lea.vmem %s104_s12, 1024 }
   0x5   : > { %p1085_p7 = scmp.ne.s32.totalorder %s104_s12, %s1084_s15  ;;  %p1092_p10 = scmp.lt.s32.totalorder %s104_s12, %s104_s12 }
   0x6   : > { %p1032_p4 = pneg %p1137_p2  ;;  %p1093_p11 = scmp.lt.s32.totalorder %s1084_s15, %s1084_s15 }
   0x8   : > { %p1033_p5 = pnand %p1141_p3, %p1032_p4  ;;  %p1094_p12 = por %p1093_p11, %p1092_p10 }
   0xa   : > { %p1075_p6 = pneg %p1033_p5 }
   0xc   : > { %p1087_p8 = pnand %p1085_p7, %p1075_p6 }
   0xe   : > { %p1088_p9 = pneg %p1087_p8 }
  0x10   : > { %p1095_p13 = pnand %p1094_p12, %p1088_p9 }
  0x12   : > { %1098 = shalt.err (!%p1095_p13)
}
  0x13   : > { %s1112_s16 = smov 64   ;;  %s1113_s17 = smov 4  }
  0x14   : > { %1035 = dma.hbm_to_vmem [thread:$0]  (!%p1033_p5), %s1211_s1, 1024, %s104_s12, [#allocation3], %s1112_s16, %s1112_s16, %s1113_s17  }
  0x15   : > { %128 = sbr.rel (%p1137_p2) target bundleno = 286 (0x11e), region = 28 }
  0x1a   : > { %1104 = dma.done.wait (%p1141_p3), [#allocation3], 1024  }
  0x1b   : > { %1106 = vsyncadd (%p1141_p3), [#allocation3], 4294966272  ;;  %s751_s20 = sshll.u32 %s744_s10, 5  ;;  %v1049_v0 = vld [vmem:[#allocation2 + $0x38] sm:$0xff]   ;;  %v1050_v1 = vld [vmem:[#allocation2 + $0x30] sm:$0xff]  }
  0x1c   : > { %p151_p0 = scmp.lt.s32.totalorder %s751_s20, 63  ;;  %964 = vmatprep.subr.bf16.mxu0 %v1049_v0  ;;  %1012 = vmatprep.subr.bf16.mxu1 %v1049_v0  ;;  %v1051_v2 = vld [vmem:[#allocation2 + $0x28] sm:$0xff]   ;;  %v1052_v3 = vld [vmem:[#allocation2 + $0x20] sm:$0xff]   ;;  %v1053_v6 = vld [vmem:[#allocation2 + $0x18] sm:$0xff]  }
  0x1d   : > { %965 = vmatpush3.bf16.msra.mxu0 %v1049_v0  ;;  %1020 = vmatpush3.bf16.msra.mxu1 %v1049_v0  ;;  %v1054_v7 = vld [vmem:[#allocation2 + $0x10] sm:$0xff]   ;;  %v1055_v8 = vld [vmem:[#allocation2 + $0x8] sm:$0xff]   ;;  %v1056_v9 = vld [vmem:[#allocation2] sm:$0xff]  }
  0x1e   : > { %s1216_s20 = smov (!%p151_p0, %s751_s20), 63  ;;  %966 = vmatprep.subr.bf16.mxu0 %v1050_v1  ;;  %1013 = vmatprep.subr.bf16.mxu1 %v1050_v1 }
  0x1f   : > { %s752_s21 = sshll.u32 %s1216_s20, 2 }
  0x20   : > { %s1166_s24 = scalar_lea.vmem %s1210_s0, %s752_s21  ;;  %s1189_s27 = scalar_lea.vmem %s1212_s2, %s752_s21 }
  0x21   : > { %967 = vmatpush3.bf16.msra.mxu0 %v1050_v1  ;;  %1021 = vmatpush3.bf16.msra.mxu1 %v1050_v1  ;;  %v1057_v4 = vld [vmem:[%s1166_s24] sm:$0xff]   ;;  %v1059_v10 = vld [vmem:[%s1166_s24 + $0x8] sm:$0xff]   ;;  %v1061_v12 = vld [vmem:[%s1166_s24 + $0x10] sm:$0xff]  }
  0x22   : > { %968 = vmatprep.subr.bf16.mxu0 %v1051_v2  ;;  %1014 = vmatprep.subr.bf16.mxu1 %v1051_v2  ;;  %v1058_v5 = vld [vmem:[%s1166_s24 + $0x40] sm:$0xff]   ;;  %v1060_v11 = vld [vmem:[%s1166_s24 + $0x48] sm:$0xff]   ;;  %v1062_v13 = vld [vmem:[%s1166_s24 + $0x50] sm:$0xff]  }
  0x23   : > { %980 = vmatprep.mubr.bf16.mxu0 %v1057_v4  ;;  %996 = vmatprep.mubr.bf16.mxu1 %v1058_v5  ;;  %v1063_v14 = vld [vmem:[%s1166_s24 + $0x18] sm:$0xff]   ;;  %v1065_v16 = vld [vmem:[%s1166_s24 + $0x20] sm:$0xff]   ;;  %v1067_v18 = vld [vmem:[%s1166_s24 + $0x28] sm:$0xff]  }
  0x24   : > { %v1064_v15 = vld [vmem:[%s1166_s24 + $0x58] sm:$0xff]   ;;  %v1066_v17 = vld [vmem:[%s1166_s24 + $0x60] sm:$0xff]   ;;  %v1068_v19 = vld [vmem:[%s1166_s24 + $0x68] sm:$0xff]  }
  0x25   : > { %969 = vmatpush3.bf16.msra.mxu0 %v1051_v2  ;;  %1022 = vmatpush3.bf16.msra.mxu1 %v1051_v2  ;;  %v1069_v20 = vld [vmem:[%s1166_s24 + $0x30] sm:$0xff]   ;;  %v1071_v22 = vld [vmem:[%s1166_s24 + $0x38] sm:$0xff]  }
  0x26   : > { %970 = vmatprep.subr.bf16.mxu0 %v1052_v3  ;;  %1015 = vmatprep.subr.bf16.mxu1 %v1052_v3  ;;  %v1070_v21 = vld [vmem:[%s1166_s24 + $0x70] sm:$0xff]   ;;  %v1072_v23 = vld [vmem:[%s1166_s24 + $0x78] sm:$0xff]  }
  0x29   : > { %971 = vmatpush3.bf16.msra.mxu0 %v1052_v3  ;;  %1023 = vmatpush3.bf16.msra.mxu1 %v1052_v3 }
  0x2a   : > { %972 = vmatprep.subr.bf16.mxu0 %v1053_v6  ;;  %1016 = vmatprep.subr.bf16.mxu1 %v1053_v6 }
  0x2d   : > { %973 = vmatpush3.bf16.msra.mxu0 %v1053_v6  ;;  %1024 = vmatpush3.bf16.msra.mxu1 %v1053_v6 }
  0x2e   : > { %974 = vmatprep.subr.bf16.mxu0 %v1054_v7  ;;  %1017 = vmatprep.subr.bf16.mxu1 %v1054_v7 }
  0x31   : > { %975 = vmatpush3.bf16.msra.mxu0 %v1054_v7  ;;  %1025 = vmatpush3.bf16.msra.mxu1 %v1054_v7 }
  0x32   : > { %976 = vmatprep.subr.bf16.mxu0 %v1055_v8  ;;  %1018 = vmatprep.subr.bf16.mxu1 %v1055_v8 }
  0x35   : > { %977 = vmatpush3.bf16.msra.mxu0 %v1055_v8  ;;  %1026 = vmatpush3.bf16.msra.mxu1 %v1055_v8 }
  0x36   : > { %978 = vmatprep.subr.bf16.mxu0 %v1056_v9  ;;  %1019 = vmatprep.subr.bf16.mxu1 %v1056_v9 }
  0x39   : > { %979 = vmatpush3.bf16.msra.mxu0 %v1056_v9  ;;  %1027 = vmatpush3.bf16.msra.mxu1 %v1056_v9 }
  0x3c   : > { %981 = vmatmul.mubr.bf16.vlgmr.msra.gmra.mxu0 %v1059_v10  ;;  %997 = vmatmul.mubr.bf16.vlgmr.msra.gmra.mxu1 %v1060_v11 }
  0x3d   : > { %984 = vmatprep.mubr.bf16.mxu0 %v1061_v12  ;;  %1000 = vmatprep.mubr.bf16.mxu1 %v1062_v13 }
  0x44   : > { %985 = vmatmul.mubr.bf16.gmra.mxu0 %v1063_v14  ;;  %1001 = vmatmul.mubr.bf16.gmra.mxu1 %v1064_v15 }
  0x45   : > { %988 = vmatprep.mubr.bf16.mxu0 %v1065_v16  ;;  %1004 = vmatprep.mubr.bf16.mxu1 %v1066_v17 }
  0x4c   : > { %989 = vmatmul.mubr.bf16.gmra.mxu0 %v1067_v18  ;;  %1005 = vmatmul.mubr.bf16.gmra.mxu1 %v1068_v19 }
  0x4d   : > { %992 = vmatprep.mubr.bf16.mxu0 %v1069_v20  ;;  %1008 = vmatprep.mubr.bf16.mxu1 %v1070_v21 }
  0x54   : > { %993 = vmatmul.mubr.bf16.gmra.mxu0 %v1071_v22  ;;  %1009 = vmatmul.mubr.bf16.gmra.mxu1 %v1072_v23 }
  0xfc   : > { %v982_v24 = vpop.f32.mrf.mxu0  ;;  %v998_v25 = vpop.f32.mrf.mxu1 }
  0xfe   : > { %v389_v26 = vpop.f32.mrf.mxu0  ;;  %v453_v27 = vpop.f32.mrf.mxu1 }
 0x100   : > { %v983_v28 = vpop.f32.mrf.mxu0  ;;  %v999_v29 = vpop.f32.mrf.mxu1 }
 0x101   : > { %v853_v30 = vpack.c.bf16 %v983_v28, %v982_v24  ;;  %v893_v31 = vpack.c.bf16 %v999_v29, %v998_v25 }
 0x102   : > { %v392_v32 = vpop.f32.mrf.mxu0  ;;  %v456_v33 = vpop.f32.mrf.mxu1 }
 0x103   : > { %925 = vst [vmem:[%s1189_s27 + $0x8] sm:$0xff] %v853_v30   ;;  %933 = vst [vmem:[%s1189_s27 + $0x48] sm:$0xff] %v893_v31   ;;  %v848_v34 = vpack.c.bf16 %v392_v32, %v389_v26  ;;  %v888_v35 = vpack.c.bf16 %v456_v33, %v453_v27 }
 0x104   : > { %v986_v36 = vpop.f32.mrf.mxu0  ;;  %v1002_v37 = vpop.f32.mrf.mxu1 }
 0x105   : > { %849 = vst [vmem:[%s1189_s27] sm:$0xff] %v848_v34   ;;  %932 = vst [vmem:[%s1189_s27 + $0x40] sm:$0xff] %v888_v35  }
 0x106   : > { %v405_v38 = vpop.f32.mrf.mxu0  ;;  %v469_v39 = vpop.f32.mrf.mxu1 }
 0x108   : > { %v987_v40 = vpop.f32.mrf.mxu0  ;;  %v1003_v41 = vpop.f32.mrf.mxu1 }
 0x109   : > { %v863_v42 = vpack.c.bf16 %v987_v40, %v986_v36  ;;  %v903_v43 = vpack.c.bf16 %v1003_v41, %v1002_v37 }
 0x10a   : > { %v408_v44 = vpop.f32.mrf.mxu0  ;;  %v472_v45 = vpop.f32.mrf.mxu1 }
 0x10b   : > { %927 = vst [vmem:[%s1189_s27 + $0x18] sm:$0xff] %v863_v42   ;;  %935 = vst [vmem:[%s1189_s27 + $0x58] sm:$0xff] %v903_v43   ;;  %v858_v46 = vpack.c.bf16 %v408_v44, %v405_v38  ;;  %v898_v47 = vpack.c.bf16 %v472_v45, %v469_v39 }
 0x10c   : > { %v990_v48 = vpop.f32.mrf.mxu0  ;;  %v1006_v49 = vpop.f32.mrf.mxu1 }
 0x10d   : > { %926 = vst [vmem:[%s1189_s27 + $0x10] sm:$0xff] %v858_v46   ;;  %934 = vst [vmem:[%s1189_s27 + $0x50] sm:$0xff] %v898_v47  }
 0x10e   : > { %v421_v50 = vpop.f32.mrf.mxu0  ;;  %v485_v51 = vpop.f32.mrf.mxu1 }
 0x110   : > { %v991_v52 = vpop.f32.mrf.mxu0  ;;  %v1007_v53 = vpop.f32.mrf.mxu1 }
 0x111   : > { %v873_v54 = vpack.c.bf16 %v991_v52, %v990_v48  ;;  %v913_v55 = vpack.c.bf16 %v1007_v53, %v1006_v49 }
 0x112   : > { %v424_v56 = vpop.f32.mrf.mxu0  ;;  %v488_v57 = vpop.f32.mrf.mxu1 }
 0x113   : > { %929 = vst [vmem:[%s1189_s27 + $0x28] sm:$0xff] %v873_v54   ;;  %937 = vst [vmem:[%s1189_s27 + $0x68] sm:$0xff] %v913_v55   ;;  %v868_v58 = vpack.c.bf16 %v424_v56, %v421_v50  ;;  %v908_v59 = vpack.c.bf16 %v488_v57, %v485_v51 }
 0x114   : > { %v994_v60 = vpop.f32.mrf.mxu0  ;;  %v1010_v61 = vpop.f32.mrf.mxu1 }
 0x115   : > { %928 = vst [vmem:[%s1189_s27 + $0x20] sm:$0xff] %v868_v58   ;;  %936 = vst [vmem:[%s1189_s27 + $0x60] sm:$0xff] %v908_v59  }
 0x116   : > { %v437_v62 = vpop.f32.mrf.mxu0  ;;  %v501_v63 = vpop.f32.mrf.mxu1 }
 0x118   : > { %v995_v0 = vpop.f32.mrf.mxu0  ;;  %v1011_v1 = vpop.f32.mrf.mxu1 }
 0x119   : > { %v883_v2 = vpack.c.bf16 %v995_v0, %v994_v60  ;;  %v923_v3 = vpack.c.bf16 %v1011_v1, %v1010_v61 }
 0x11a   : > { %v440_v4 = vpop.f32.mrf.mxu0  ;;  %v504_v5 = vpop.f32.mrf.mxu1 }
 0x11b   : > { %931 = vst [vmem:[%s1189_s27 + $0x38] sm:$0xff] %v883_v2   ;;  %939 = vst [vmem:[%s1189_s27 + $0x78] sm:$0xff] %v923_v3   ;;  %v878_v6 = vpack.c.bf16 %v440_v4, %v437_v62  ;;  %v918_v7 = vpack.c.bf16 %v504_v5, %v501_v63 }
 0x11d   : > { %930 = vst [vmem:[%s1189_s27 + $0x30] sm:$0xff] %v878_v6   ;;  %938 = vst [vmem:[%s1189_s27 + $0x70] sm:$0xff] %v918_v7  }
 0x11e PF: > { %s13_s9 = sadd.s32 1, %s1109_s9  }
 0x11f   : > { %p10_p1 = scmp.ge.s32.totalorder %s13_s9, 4  }
 0x121   :  { %12 = sbr.rel (!%p10_p1) target bundleno = 1 (0x1), region = 63 }
 0x126   :  { %698 = vsyncpa [#allocation3], 1 }
 0x127   :  { %700 = vsyncpa [#allocation3 + $0x1], 1 }

// kernel: gcn_forward.5
= control target key start
LH: loop header
LB: loop body
LE: loop exit
PB: predicated region body
PF: predicated region fallthrough
CT: control target
= control target key end

     0   :  { %s1733_s12 = smov 0   ;;  %s1989_s0 = inlined_call_operand.vmem [shape: bf16[512,512], index: 0, kind: input, shape index: {}]   ;;  %s1990_s1 = inlined_call_operand.vmem [shape: bf16[512,128], index: 1, kind: input, shape index: {}]   ;;  %s1991_s2 = inlined_call_operand.vmem [shape: f32[1,128], index: 2, kind: input, shape index: {}]   ;;  %s1992_s3 = inlined_call_operand.vmem [shape: f32[512,128], index: 3, kind: output, shape index: {}]  }
   0x1 LB: > { %s1235_s13 = sadd.s32 4294967295, %s1711_s12   ;;  %p1239_p0 = scmp.ge.s32.totalorder %s1711_s12, 1  ;;  %s1711_s12 = sphi %s1733_s12, %s13_s12  }
   0x2   : > { %p139_p1 = scmp.lt.s32.totalorder %s1711_s12, 3 }
   0x4   : > { %p140_p2 = pnand %p1239_p0, %p139_p1 }
   0x5   : > { %s1240_s21 = sshll.u32 (!%p140_p2), %s1235_s13, 5 }
   0x6   : > { %143 = sbr.rel (%p140_p2) target bundleno = 371 (0x173), region = 32  ;;  %p165_p3 = scmp.lt.s32.totalorder (!%p140_p2), %s1240_s21, 63 }
   0xb   : > { %v1577_v0 = vld [vmem:[%s1990_s1 + $0x78] sm:$0xff]   ;;  %v1581_v4 = vld [vmem:[%s1990_s1 + $0x70] sm:$0xff]   ;;  %v1585_v8 = vld [vmem:[%s1990_s1 + $0x68] sm:$0xff]   ;;  %s1994_s21 = smov (!%p165_p3, %s1240_s21), 63 }
   0xc   : > { %v1578_v1 = vld [vmem:[%s1990_s1 + $0xf8] sm:$0xff]   ;;  %1345 = vmatprep.subr.bf16.mxu0 %v1577_v0  ;;  %v1582_v5 = vld [vmem:[%s1990_s1 + $0xf0] sm:$0xff]   ;;  %v1586_v9 = vld [vmem:[%s1990_s1 + $0xe8] sm:$0xff]   ;;  %s1344_s18 = sshll.u32 %s1994_s21, 4  ;;  %s1244_s7 = sshll.u32 %s1994_s21, 3 }
   0xd   : > { %v1579_v2 = vld [vmem:[%s1990_s1 + $0x38] sm:$0xff]   ;;  %1457 = vmatprep.subr.bf16.mxu1 %v1578_v1  ;;  %v1583_v6 = vld [vmem:[%s1990_s1 + $0x30] sm:$0xff]   ;;  %v1587_v10 = vld [vmem:[%s1990_s1 + $0x28] sm:$0xff]   ;;  %s1839_s28 = scalar_lea.vmem %s1989_s0, %s1344_s18  ;;  %s1921_s10 = scalar_lea.vmem %s1992_s3, %s1244_s7 }
   0xe   : > { %v1580_v3 = vld [vmem:[%s1990_s1 + $0xb8] sm:$0xff]   ;;  %1346 = vmatpush3.bf16.msra.mxu0 %v1579_v2  ;;  %v1584_v7 = vld [vmem:[%s1990_s1 + $0xb0] sm:$0xff]   ;;  %v1588_v11 = vld [vmem:[%s1990_s1 + $0xa8] sm:$0xff]  }
   0xf   : > { %1458 = vmatpush3.bf16.msra.mxu1 %v1580_v3  ;;  %1347 = vmatprep.subr.bf16.mxu0 %v1581_v4  ;;  %v1589_v12 = vld [vmem:[%s1990_s1 + $0x60] sm:$0xff]   ;;  %v1593_v16 = vld [vmem:[%s1990_s1 + $0x58] sm:$0xff]   ;;  %v1597_v20 = vld [vmem:[%s1990_s1 + $0x50] sm:$0xff]  }
  0x10   : > { %1459 = vmatprep.subr.bf16.mxu1 %v1582_v5  ;;  %v1590_v13 = vld [vmem:[%s1990_s1 + $0xe0] sm:$0xff]   ;;  %v1594_v17 = vld [vmem:[%s1990_s1 + $0xd8] sm:$0xff]   ;;  %v1598_v21 = vld [vmem:[%s1990_s1 + $0xd0] sm:$0xff]  }
  0x11   : > { %v1591_v14 = vld [vmem:[%s1990_s1 + $0x20] sm:$0xff]   ;;  %v1595_v18 = vld [vmem:[%s1990_s1 + $0x18] sm:$0xff]   ;;  %v1599_v22 = vld [vmem:[%s1990_s1 + $0x10] sm:$0xff]  }
  0x12   : > { %1348 = vmatpush3.bf16.msra.mxu0 %v1583_v6  ;;  %v1592_v15 = vld [vmem:[%s1990_s1 + $0xa0] sm:$0xff]   ;;  %v1596_v19 = vld [vmem:[%s1990_s1 + $0x98] sm:$0xff]   ;;  %v1600_v23 = vld [vmem:[%s1990_s1 + $0x90] sm:$0xff]  }
  0x13   : > { %1460 = vmatpush3.bf16.msra.mxu1 %v1584_v7  ;;  %1349 = vmatprep.subr.bf16.mxu0 %v1585_v8  ;;  %v1601_v24 = vld [vmem:[%s1990_s1 + $0x48] sm:$0xff]   ;;  %v1605_v28 = vld [vmem:[%s1990_s1 + $0x40] sm:$0xff]  }
  0x14   : > { %1461 = vmatprep.subr.bf16.mxu1 %v1586_v9  ;;  %v1602_v25 = vld [vmem:[%s1990_s1 + $0xc8] sm:$0xff]   ;;  %v1606_v29 = vld [vmem:[%s1990_s1 + $0xc0] sm:$0xff]  }
  0x15   : > { %v1603_v26 = vld [vmem:[%s1990_s1 + $0x8] sm:$0xff]   ;;  %v1607_v30 = vld [vmem:[%s1990_s1] sm:$0xff]  }
  0x16   : > { %1350 = vmatpush3.bf16.msra.mxu0 %v1587_v10  ;;  %v1604_v27 = vld [vmem:[%s1990_s1 + $0x88] sm:$0xff]   ;;  %v1608_v31 = vld [vmem:[%s1990_s1 + $0x80] sm:$0xff]  }
  0x17   : > { %1462 = vmatpush3.bf16.msra.mxu1 %v1588_v11  ;;  %1351 = vmatprep.subr.bf16.mxu0 %v1589_v12  ;;  %v1609_v32 = vld [vmem:[%s1839_s28] ss:$16 sps:$4 sm:$0xff]   ;;  %v1611_v33 = vld [vmem:[%s1839_s28 + $0x4] ss:$16 sps:$4 sm:$0xff]   ;;  %v1612_v34 = vld [vmem:[%s1839_s28 + $0x8] ss:$16 sps:$4 sm:$0xff]  }
  0x18   : > { %1463 = vmatprep.subr.bf16.mxu1 %v1590_v13  ;;  %v1614_v35 = vld [vmem:[%s1839_s28 + $0xc] ss:$16 sps:$4 sm:$0xff]   ;;  %857 = vmatprep.mubr.bf16.mxu0 %v1611_v33  ;;  %v1615_v36 = vld [vmem:[%s1839_s28 + $0x24] ss:$16 sps:$4 sm:$0xff]   ;;  %v1619_v38 = vld [vmem:[%s1839_s28 + $0x20] ss:$16 sps:$4 sm:$0xff]  }
  0x19   : > { %1018 = vmatprep.mubr.bf16.mxu1 %v1614_v35  ;;  %v1617_v37 = vld [vmem:[%s1839_s28 + $0x2c] ss:$16 sps:$4 sm:$0xff]   ;;  %v1620_v39 = vld [vmem:[%s1839_s28 + $0x28] ss:$16 sps:$4 sm:$0xff]   ;;  %v1621_v40 = vld [vmem:[%s1839_s28 + $0x44] ss:$16 sps:$4 sm:$0xff]  }
  0x1a   : > { %1352 = vmatpush3.bf16.msra.mxu0 %v1591_v14  ;;  %v1623_v41 = vld [vmem:[%s1839_s28 + $0x4c] ss:$16 sps:$4 sm:$0xff]   ;;  %v1625_v42 = vld [vmem:[%s1839_s28 + $0x40] ss:$16 sps:$4 sm:$0xff]   ;;  %v1626_v43 = vld [vmem:[%s1839_s28 + $0x48] ss:$16 sps:$4 sm:$0xff]  }
  0x1b   : > { %1464 = vmatpush3.bf16.msra.mxu1 %v1592_v15  ;;  %1353 = vmatprep.subr.bf16.mxu0 %v1593_v16  ;;  %v1627_v44 = vld [vmem:[%s1839_s28 + $0x64] ss:$16 sps:$4 sm:$0xff]   ;;  %v1629_v45 = vld [vmem:[%s1839_s28 + $0x6c] ss:$16 sps:$4 sm:$0xff]   ;;  %v1631_v46 = vld [vmem:[%s1839_s28 + $0x60] ss:$16 sps:$4 sm:$0xff]  }
  0x1c   : > { %1465 = vmatprep.subr.bf16.mxu1 %v1594_v17  ;;  %v1632_v47 = vld [vmem:[%s1839_s28 + $0x68] ss:$16 sps:$4 sm:$0xff]   ;;  %v1633_v48 = vld [vmem:[%s1839_s28 + $0x84] ss:$16 sps:$4 sm:$0xff]   ;;  %v1635_v49 = vld [vmem:[%s1839_s28 + $0x8c] ss:$16 sps:$4 sm:$0xff]  }
  0x1d   : > { %v1637_v50 = vld [vmem:[%s1839_s28 + $0x80] ss:$16 sps:$4 sm:$0xff]   ;;  %v1638_v51 = vld [vmem:[%s1839_s28 + $0x88] ss:$16 sps:$4 sm:$0xff]   ;;  %v1639_v52 = vld [vmem:[%s1839_s28 + $0xa4] ss:$16 sps:$4 sm:$0xff]  }
  0x1e   : > { %1354 = vmatpush3.bf16.msra.mxu0 %v1595_v18  ;;  %v1641_v53 = vld [vmem:[%s1839_s28 + $0xac] ss:$16 sps:$4 sm:$0xff]   ;;  %v1643_v54 = vld [vmem:[%s1839_s28 + $0xa0] ss:$16 sps:$4 sm:$0xff]   ;;  %v1644_v55 = vld [vmem:[%s1839_s28 + $0xa8] ss:$16 sps:$4 sm:$0xff]  }
  0x1f   : > { %1466 = vmatpush3.bf16.msra.mxu1 %v1596_v19  ;;  %1355 = vmatprep.subr.bf16.mxu0 %v1597_v20  ;;  %v1645_v56 = vld [vmem:[%s1839_s28 + $0xc4] ss:$16 sps:$4 sm:$0xff]   ;;  %v1647_v57 = vld [vmem:[%s1839_s28 + $0xcc] ss:$16 sps:$4 sm:$0xff]   ;;  %v1649_v58 = vld [vmem:[%s1839_s28 + $0xc0] ss:$16 sps:$4 sm:$0xff]  }
  0x20   : > { %1467 = vmatprep.subr.bf16.mxu1 %v1598_v21  ;;  %v1650_v59 = vld [vmem:[%s1839_s28 + $0xc8] ss:$16 sps:$4 sm:$0xff]   ;;  %v1651_v60 = vld [vmem:[%s1839_s28 + $0xe4] ss:$16 sps:$4 sm:$0xff]   ;;  %v1653_v61 = vld [vmem:[%s1839_s28 + $0xec] ss:$16 sps:$4 sm:$0xff]  }
  0x21   : > { %v1655_v62 = vld [vmem:[%s1839_s28 + $0xe0] ss:$16 sps:$4 sm:$0xff]   ;;  %v1656_v63 = vld [vmem:[%s1839_s28 + $0xe8] ss:$16 sps:$4 sm:$0xff]   ;;  %v1657_v0 = vld [vmem:[%s1839_s28 + $0x104] ss:$16 sps:$4 sm:$0xff]  }
  0x22   : > { %1356 = vmatpush3.bf16.msra.mxu0 %v1599_v22  ;;  %v1659_v1 = vld [vmem:[%s1839_s28 + $0x10c] ss:$16 sps:$4 sm:$0xff]   ;;  %v1661_v2 = vld [vmem:[%s1839_s28 + $0x100] ss:$16 sps:$4 sm:$0xff]   ;;  %v1662_v3 = vld [vmem:[%s1839_s28 + $0x108] ss:$16 sps:$4 sm:$0xff]  }
  0x23   : > { %1468 = vmatpush3.bf16.msra.mxu1 %v1600_v23  ;;  %1357 = vmatprep.subr.bf16.mxu0 %v1601_v24  ;;  %v1663_v4 = vld [vmem:[%s1839_s28 + $0x124] ss:$16 sps:$4 sm:$0xff]   ;;  %v1665_v5 = vld [vmem:[%s1839_s28 + $0x12c] ss:$16 sps:$4 sm:$0xff]   ;;  %v1667_v6 = vld [vmem:[%s1839_s28 + $0x120] ss:$16 sps:$4 sm:$0xff]  }
  0x24   : > { %1469 = vmatprep.subr.bf16.mxu1 %v1602_v25  ;;  %v1668_v7 = vld [vmem:[%s1839_s28 + $0x128] ss:$16 sps:$4 sm:$0xff]   ;;  %v1669_v8 = vld [vmem:[%s1839_s28 + $0x144] ss:$16 sps:$4 sm:$0xff]   ;;  %v1671_v9 = vld [vmem:[%s1839_s28 + $0x14c] ss:$16 sps:$4 sm:$0xff]  }
  0x25   : > { %v1673_v10 = vld [vmem:[%s1839_s28 + $0x140] ss:$16 sps:$4 sm:$0xff]   ;;  %v1674_v11 = vld [vmem:[%s1839_s28 + $0x148] ss:$16 sps:$4 sm:$0xff]   ;;  %v1675_v12 = vld [vmem:[%s1839_s28 + $0x164] ss:$16 sps:$4 sm:$0xff]  }
  0x26   : > { %1358 = vmatpush3.bf16.msra.mxu0 %v1603_v26  ;;  %v1677_v13 = vld [vmem:[%s1839_s28 + $0x16c] ss:$16 sps:$4 sm:$0xff]   ;;  %v1679_v14 = vld [vmem:[%s1839_s28 + $0x160] ss:$16 sps:$4 sm:$0xff]   ;;  %v1680_v15 = vld [vmem:[%s1839_s28 + $0x168] ss:$16 sps:$4 sm:$0xff]  }
  0x27   : > { %1470 = vmatpush3.bf16.msra.mxu1 %v1604_v27  ;;  %1359 = vmatprep.subr.bf16.mxu0 %v1605_v28  ;;  %v1681_v16 = vld [vmem:[%s1839_s28 + $0x184] ss:$16 sps:$4 sm:$0xff]   ;;  %v1683_v17 = vld [vmem:[%s1839_s28 + $0x18c] ss:$16 sps:$4 sm:$0xff]   ;;  %v1685_v18 = vld [vmem:[%s1839_s28 + $0x180] ss:$16 sps:$4 sm:$0xff]  }
  0x28   : > { %1471 = vmatprep.subr.bf16.mxu1 %v1606_v29  ;;  %v1686_v19 = vld [vmem:[%s1839_s28 + $0x188] ss:$16 sps:$4 sm:$0xff]   ;;  %v1687_v20 = vld [vmem:[%s1839_s28 + $0x1a4] ss:$16 sps:$4 sm:$0xff]   ;;  %v1689_v21 = vld [vmem:[%s1839_s28 + $0x1ac] ss:$16 sps:$4 sm:$0xff]  }
  0x29   : > { %v1691_v22 = vld [vmem:[%s1839_s28 + $0x1a0] ss:$16 sps:$4 sm:$0xff]   ;;  %v1692_v23 = vld [vmem:[%s1839_s28 + $0x1a8] ss:$16 sps:$4 sm:$0xff]   ;;  %v1693_v24 = vld [vmem:[%s1839_s28 + $0x1c4] ss:$16 sps:$4 sm:$0xff]  }
  0x2a   : > { %1360 = vmatpush3.bf16.msra.mxu0 %v1607_v30  ;;  %v1695_v25 = vld [vmem:[%s1839_s28 + $0x1cc] ss:$16 sps:$4 sm:$0xff]   ;;  %v1697_v26 = vld [vmem:[%s1839_s28 + $0x1c0] ss:$16 sps:$4 sm:$0xff]   ;;  %v1698_v27 = vld [vmem:[%s1839_s28 + $0x1c8] ss:$16 sps:$4 sm:$0xff]  }
  0x2b   : > { %1472 = vmatpush3.bf16.msra.mxu1 %v1608_v31  ;;  %v1699_v28 = vld [vmem:[%s1839_s28 + $0x1e4] ss:$16 sps:$4 sm:$0xff]   ;;  %v1701_v29 = vld [vmem:[%s1839_s28 + $0x1ec] ss:$16 sps:$4 sm:$0xff]   ;;  %v1703_v30 = vld [vmem:[%s1839_s28 + $0x1e0] ss:$16 sps:$4 sm:$0xff]  }
  0x2c   : > { %v1704_v31 = vld [vmem:[%s1839_s28 + $0x1e8] ss:$16 sps:$4 sm:$0xff]  }
  0x2d   : > { %858 = vmatmul.mubr.bf16.vlgmr.msra.gmra.mxu0 %v1609_v32 }
  0x2e   : > { %1019 = vmatmul.mubr.bf16.vlgmr.msra.gmra.mxu1 %v1612_v34  ;;  %865 = vmatprep.mubr.bf16.mxu0 %v1615_v36  ;;  %v1914_v34 = vld [vmem:[%s1991_s2] ss:$0 sm:$0xff] }
  0x2f   : > { %1026 = vmatprep.mubr.bf16.mxu1 %v1617_v37 }
  0x35   : > { %866 = vmatmul.mubr.bf16.gmra.mxu0 %v1619_v38 }
  0x36   : > { %1027 = vmatmul.mubr.bf16.gmra.mxu1 %v1620_v39  ;;  %873 = vmatprep.mubr.bf16.mxu0 %v1621_v40 }
  0x37   : > { %1034 = vmatprep.mubr.bf16.mxu1 %v1623_v41 }
  0x3d   : > { %874 = vmatmul.mubr.bf16.gmra.mxu0 %v1625_v42 }
  0x3e   : > { %1035 = vmatmul.mubr.bf16.gmra.mxu1 %v1626_v43  ;;  %881 = vmatprep.mubr.bf16.mxu0 %v1627_v44 }
  0x3f   : > { %1042 = vmatprep.mubr.bf16.mxu1 %v1629_v45 }
  0x45   : > { %882 = vmatmul.mubr.bf16.gmra.mxu0 %v1631_v46 }
  0x46   : > { %1043 = vmatmul.mubr.bf16.gmra.mxu1 %v1632_v47  ;;  %889 = vmatprep.mubr.bf16.mxu0 %v1633_v48 }
  0x47   : > { %1050 = vmatprep.mubr.bf16.mxu1 %v1635_v49 }
  0x4d   : > { %890 = vmatmul.mubr.bf16.gmra.mxu0 %v1637_v50 }
  0x4e   : > { %1051 = vmatmul.mubr.bf16.gmra.mxu1 %v1638_v51  ;;  %897 = vmatprep.mubr.bf16.mxu0 %v1639_v52 }
  0x4f   : > { %1058 = vmatprep.mubr.bf16.mxu1 %v1641_v53 }
  0x55   : > { %898 = vmatmul.mubr.bf16.gmra.mxu0 %v1643_v54 }
  0x56   : > { %1059 = vmatmul.mubr.bf16.gmra.mxu1 %v1644_v55  ;;  %905 = vmatprep.mubr.bf16.mxu0 %v1645_v56 }
  0x57   : > { %1066 = vmatprep.mubr.bf16.mxu1 %v1647_v57 }
  0x5d   : > { %906 = vmatmul.mubr.bf16.gmra.mxu0 %v1649_v58 }
  0x5e   : > { %1067 = vmatmul.mubr.bf16.gmra.mxu1 %v1650_v59  ;;  %913 = vmatprep.mubr.bf16.mxu0 %v1651_v60 }
  0x5f   : > { %1074 = vmatprep.mubr.bf16.mxu1 %v1653_v61 }
  0x65   : > { %914 = vmatmul.mubr.bf16.gmra.mxu0 %v1655_v62 }
  0x66   : > { %1075 = vmatmul.mubr.bf16.gmra.mxu1 %v1656_v63  ;;  %921 = vmatprep.mubr.bf16.mxu0 %v1657_v0 }
  0x67   : > { %1082 = vmatprep.mubr.bf16.mxu1 %v1659_v1 }
  0x6d   : > { %922 = vmatmul.mubr.bf16.gmra.mxu0 %v1661_v2 }
  0x6e   : > { %1083 = vmatmul.mubr.bf16.gmra.mxu1 %v1662_v3  ;;  %929 = vmatprep.mubr.bf16.mxu0 %v1663_v4 }
  0x6f   : > { %1090 = vmatprep.mubr.bf16.mxu1 %v1665_v5 }
  0x75   : > { %930 = vmatmul.mubr.bf16.gmra.mxu0 %v1667_v6 }
  0x76   : > { %1091 = vmatmul.mubr.bf16.gmra.mxu1 %v1668_v7  ;;  %937 = vmatprep.mubr.bf16.mxu0 %v1669_v8 }
  0x77   : > { %1098 = vmatprep.mubr.bf16.mxu1 %v1671_v9 }
  0x7d   : > { %938 = vmatmul.mubr.bf16.gmra.mxu0 %v1673_v10 }
  0x7e   : > { %1099 = vmatmul.mubr.bf16.gmra.mxu1 %v1674_v11  ;;  %945 = vmatprep.mubr.bf16.mxu0 %v1675_v12 }
  0x7f   : > { %1106 = vmatprep.mubr.bf16.mxu1 %v1677_v13 }
  0x85   : > { %946 = vmatmul.mubr.bf16.gmra.mxu0 %v1679_v14 }
  0x86   : > { %1107 = vmatmul.mubr.bf16.gmra.mxu1 %v1680_v15  ;;  %953 = vmatprep.mubr.bf16.mxu0 %v1681_v16 }
  0x87   : > { %1114 = vmatprep.mubr.bf16.mxu1 %v1683_v17 }
  0x8d   : > { %954 = vmatmul.mubr.bf16.gmra.mxu0 %v1685_v18 }
  0x8e   : > { %1115 = vmatmul.mubr.bf16.gmra.mxu1 %v1686_v19  ;;  %961 = vmatprep.mubr.bf16.mxu0 %v1687_v20 }
  0x8f   : > { %1122 = vmatprep.mubr.bf16.mxu1 %v1689_v21 }
  0x95   : > { %962 = vmatmul.mubr.bf16.gmra.mxu0 %v1691_v22 }
  0x96   : > { %1123 = vmatmul.mubr.bf16.gmra.mxu1 %v1692_v23  ;;  %969 = vmatprep.mubr.bf16.mxu0 %v1693_v24 }
  0x97   : > { %1130 = vmatprep.mubr.bf16.mxu1 %v1695_v25 }
  0x9d   : > { %970 = vmatmul.mubr.bf16.gmra.mxu0 %v1697_v26 }
  0x9e   : > { %1131 = vmatmul.mubr.bf16.gmra.mxu1 %v1698_v27  ;;  %977 = vmatprep.mubr.bf16.mxu0 %v1699_v28 }
  0x9f   : > { %1138 = vmatprep.mubr.bf16.mxu1 %v1701_v29 }
  0xa5   : > { %978 = vmatmul.mubr.bf16.gmra.mxu0 %v1703_v30 }
  0xa6   : > { %1139 = vmatmul.mubr.bf16.gmra.mxu1 %v1704_v31 }
  0xed   : > { %v1361_v32 = vpop.f32.mrf.mxu0 }
  0xee   : > { %v1473_v33 = vpop.f32.mrf.mxu1 }
  0xef   : > { %v1362_v35 = vpop.f32.mrf.mxu0 }
  0xf0   : > { %v1363_v36 = vadd.f32 %v1362_v35, %v1361_v32  ;;  %v1474_v37 = vpop.f32.mrf.mxu1 }
  0xf1   : > { %v1364_v38 = vpop.f32.mrf.mxu0  ;;  %v1475_v40 = vadd.f32 %v1474_v37, %v1473_v33 }
  0xf2   : > { %v860_v39 = vadd.f32 %v1363_v36, %v1914_v34  ;;  %v1476_v41 = vpop.f32.mrf.mxu1 }
  0xf3   : > { %v1365_v42 = vpop.f32.mrf.mxu0 }
  0xf4   : > { %v1021_v43 = vadd.f32 %v1475_v40, %v860_v39  ;;  %v1366_v44 = vadd.f32 %v1365_v42, %v1364_v38  ;;  %v1477_v45 = vpop.f32.mrf.mxu1 }
  0xf5   : > { %v1367_v46 = vpop.f32.mrf.mxu0  ;;  %v1478_v48 = vadd.f32 %v1477_v45, %v1476_v41 }
  0xf6   : > { %1147 = vst [vmem:[%s1921_s10] sm:$0xff] %v1021_v43  ;;  %v863_v47 = vadd.f32 %v1366_v44, %v1914_v34  ;;  %v1479_v49 = vpop.f32.mrf.mxu1 }
  0xf7   : > { %v1368_v50 = vpop.f32.mrf.mxu0 }
  0xf8   : > { %v1024_v51 = vadd.f32 %v1478_v48, %v863_v47  ;;  %v1369_v52 = vadd.f32 %v1368_v50, %v1367_v46  ;;  %v1480_v53 = vpop.f32.mrf.mxu1 }
  0xf9   : > { %v1370_v54 = vpop.f32.mrf.mxu0  ;;  %v1481_v56 = vadd.f32 %v1480_v53, %v1479_v49 }
  0xfa   : > { %1148 = vst [vmem:[%s1921_s10 + $0x8] sm:$0xff] %v1024_v51  ;;  %v868_v55 = vadd.f32 %v1369_v52, %v1914_v34  ;;  %v1482_v57 = vpop.f32.mrf.mxu1 }
  0xfb   : > { %v1371_v58 = vpop.f32.mrf.mxu0 }
  0xfc   : > { %v1029_v59 = vadd.f32 %v1481_v56, %v868_v55  ;;  %v1372_v60 = vadd.f32 %v1371_v58, %v1370_v54  ;;  %v1483_v61 = vpop.f32.mrf.mxu1 }
  0xfd   : > { %v1373_v62 = vpop.f32.mrf.mxu0  ;;  %v1484_v0 = vadd.f32 %v1483_v61, %v1482_v57 }
  0xfe   : > { %1149 = vst [vmem:[%s1921_s10 + $0x10] sm:$0xff] %v1029_v59  ;;  %v871_v63 = vadd.f32 %v1372_v60, %v1914_v34  ;;  %v1485_v1 = vpop.f32.mrf.mxu1 }
  0xff   : > { %v1374_v2 = vpop.f32.mrf.mxu0 }
 0x100   : > { %v1032_v3 = vadd.f32 %v1484_v0, %v871_v63  ;;  %v1375_v4 = vadd.f32 %v1374_v2, %v1373_v62  ;;  %v1486_v5 = vpop.f32.mrf.mxu1 }
 0x101   : > { %v1376_v6 = vpop.f32.mrf.mxu0  ;;  %v1487_v8 = vadd.f32 %v1486_v5, %v1485_v1 }
 0x102   : > { %1150 = vst [vmem:[%s1921_s10 + $0x18] sm:$0xff] %v1032_v3  ;;  %v876_v7 = vadd.f32 %v1375_v4, %v1914_v34  ;;  %v1488_v9 = vpop.f32.mrf.mxu1 }
 0x103   : > { %v1377_v10 = vpop.f32.mrf.mxu0 }
 0x104   : > { %v1037_v11 = vadd.f32 %v1487_v8, %v876_v7  ;;  %v1378_v12 = vadd.f32 %v1377_v10, %v1376_v6  ;;  %v1489_v13 = vpop.f32.mrf.mxu1 }
 0x105   : > { %v1379_v14 = vpop.f32.mrf.mxu0  ;;  %v1490_v16 = vadd.f32 %v1489_v13, %v1488_v9 }
 0x106   : > { %1151 = vst [vmem:[%s1921_s10 + $0x20] sm:$0xff] %v1037_v11  ;;  %v879_v15 = vadd.f32 %v1378_v12, %v1914_v34  ;;  %v1491_v17 = vpop.f32.mrf.mxu1 }
 0x107   : > { %v1380_v18 = vpop.f32.mrf.mxu0 }
 0x108   : > { %v1040_v19 = vadd.f32 %v1490_v16, %v879_v15  ;;  %v1381_v20 = vadd.f32 %v1380_v18, %v1379_v14  ;;  %v1492_v21 = vpop.f32.mrf.mxu1 }
 0x109   : > { %v1382_v22 = vpop.f32.mrf.mxu0  ;;  %v1493_v24 = vadd.f32 %v1492_v21, %v1491_v17 }
 0x10a   : > { %1152 = vst [vmem:[%s1921_s10 + $0x28] sm:$0xff] %v1040_v19  ;;  %v884_v23 = vadd.f32 %v1381_v20, %v1914_v34  ;;  %v1494_v25 = vpop.f32.mrf.mxu1 }
 0x10b   : > { %v1383_v26 = vpop.f32.mrf.mxu0 }
 0x10c   : > { %v1045_v27 = vadd.f32 %v1493_v24, %v884_v23  ;;  %v1384_v28 = vadd.f32 %v1383_v26, %v1382_v22  ;;  %v1495_v29 = vpop.f32.mrf.mxu1 }
 0x10d   : > { %v1385_v30 = vpop.f32.mrf.mxu0  ;;  %v1496_v32 = vadd.f32 %v1495_v29, %v1494_v25 }
 0x10e   : > { %1153 = vst [vmem:[%s1921_s10 + $0x30] sm:$0xff] %v1045_v27  ;;  %v887_v31 = vadd.f32 %v1384_v28, %v1914_v34  ;;  %v1497_v33 = vpop.f32.mrf.mxu1 }
 0x10f   : > { %v1386_v35 = vpop.f32.mrf.mxu0 }
 0x110   : > { %v1048_v36 = vadd.f32 %v1496_v32, %v887_v31  ;;  %v1387_v37 = vadd.f32 %v1386_v35, %v1385_v30  ;;  %v1498_v38 = vpop.f32.mrf.mxu1 }
 0x111   : > { %v1388_v39 = vpop.f32.mrf.mxu0  ;;  %v1499_v41 = vadd.f32 %v1498_v38, %v1497_v33 }
 0x112   : > { %1154 = vst [vmem:[%s1921_s10 + $0x38] sm:$0xff] %v1048_v36  ;;  %v892_v40 = vadd.f32 %v1387_v37, %v1914_v34  ;;  %v1500_v42 = vpop.f32.mrf.mxu1 }
 0x113   : > { %v1389_v43 = vpop.f32.mrf.mxu0 }
 0x114   : > { %v1053_v44 = vadd.f32 %v1499_v41, %v892_v40  ;;  %v1390_v45 = vadd.f32 %v1389_v43, %v1388_v39  ;;  %v1501_v46 = vpop.f32.mrf.mxu1 }
 0x115   : > { %v1391_v47 = vpop.f32.mrf.mxu0  ;;  %v1502_v49 = vadd.f32 %v1501_v46, %v1500_v42 }
 0x116   : > { %1155 = vst [vmem:[%s1921_s10 + $0x40] sm:$0xff] %v1053_v44  ;;  %v895_v48 = vadd.f32 %v1390_v45, %v1914_v34  ;;  %v1503_v50 = vpop.f32.mrf.mxu1 }
 0x117   : > { %v1392_v51 = vpop.f32.mrf.mxu0 }
 0x118   : > { %v1056_v52 = vadd.f32 %v1502_v49, %v895_v48  ;;  %v1393_v53 = vadd.f32 %v1392_v51, %v1391_v47  ;;  %v1504_v54 = vpop.f32.mrf.mxu1 }
 0x119   : > { %v1394_v55 = vpop.f32.mrf.mxu0  ;;  %v1505_v57 = vadd.f32 %v1504_v54, %v1503_v50 }
 0x11a   : > { %1156 = vst [vmem:[%s1921_s10 + $0x48] sm:$0xff] %v1056_v52  ;;  %v900_v56 = vadd.f32 %v1393_v53, %v1914_v34  ;;  %v1506_v58 = vpop.f32.mrf.mxu1 }
 0x11b   : > { %v1395_v59 = vpop.f32.mrf.mxu0 }
 0x11c   : > { %v1061_v60 = vadd.f32 %v1505_v57, %v900_v56  ;;  %v1396_v61 = vadd.f32 %v1395_v59, %v1394_v55  ;;  %v1507_v62 = vpop.f32.mrf.mxu1 }
 0x11d   : > { %v1397_v63 = vpop.f32.mrf.mxu0  ;;  %v1508_v1 = vadd.f32 %v1507_v62, %v1506_v58 }
 0x11e   : > { %1157 = vst [vmem:[%s1921_s10 + $0x50] sm:$0xff] %v1061_v60  ;;  %v903_v0 = vadd.f32 %v1396_v61, %v1914_v34  ;;  %v1509_v2 = vpop.f32.mrf.mxu1 }
 0x11f   : > { %v1398_v3 = vpop.f32.mrf.mxu0 }
 0x120   : > { %v1064_v4 = vadd.f32 %v1508_v1, %v903_v0  ;;  %v1399_v5 = vadd.f32 %v1398_v3, %v1397_v63  ;;  %v1510_v6 = vpop.f32.mrf.mxu1 }
 0x121   : > { %v1400_v7 = vpop.f32.mrf.mxu0  ;;  %v1511_v9 = vadd.f32 %v1510_v6, %v1509_v2 }
 0x122   : > { %1158 = vst [vmem:[%s1921_s10 + $0x58] sm:$0xff] %v1064_v4  ;;  %v908_v8 = vadd.f32 %v1399_v5, %v1914_v34  ;;  %v1512_v10 = vpop.f32.mrf.mxu1 }
 0x123   : > { %v1401_v11 = vpop.f32.mrf.mxu0 }
 0x124   : > { %v1069_v12 = vadd.f32 %v1511_v9, %v908_v8  ;;  %v1402_v13 = vadd.f32 %v1401_v11, %v1400_v7  ;;  %v1513_v14 = vpop.f32.mrf.mxu1 }
 0x125   : > { %v1403_v15 = vpop.f32.mrf.mxu0  ;;  %v1514_v17 = vadd.f32 %v1513_v14, %v1512_v10 }
 0x126   : > { %1159 = vst [vmem:[%s1921_s10 + $0x60] sm:$0xff] %v1069_v12  ;;  %v911_v16 = vadd.f32 %v1402_v13, %v1914_v34  ;;  %v1515_v18 = vpop.f32.mrf.mxu1 }
 0x127   : > { %v1404_v19 = vpop.f32.mrf.mxu0 }
 0x128   : > { %v1072_v20 = vadd.f32 %v1514_v17, %v911_v16  ;;  %v1405_v21 = vadd.f32 %v1404_v19, %v1403_v15  ;;  %v1516_v22 = vpop.f32.mrf.mxu1 }
 0x129   : > { %v1406_v23 = vpop.f32.mrf.mxu0  ;;  %v1517_v25 = vadd.f32 %v1516_v22, %v1515_v18 }
 0x12a   : > { %1160 = vst [vmem:[%s1921_s10 + $0x68] sm:$0xff] %v1072_v20  ;;  %v916_v24 = vadd.f32 %v1405_v21, %v1914_v34  ;;  %v1518_v26 = vpop.f32.mrf.mxu1 }
 0x12b   : > { %v1407_v27 = vpop.f32.mrf.mxu0 }
 0x12c   : > { %v1077_v28 = vadd.f32 %v1517_v25, %v916_v24  ;;  %v1408_v29 = vadd.f32 %v1407_v27, %v1406_v23  ;;  %v1519_v30 = vpop.f32.mrf.mxu1 }
 0x12d   : > { %v1409_v31 = vpop.f32.mrf.mxu0  ;;  %v1520_v33 = vadd.f32 %v1519_v30, %v1518_v26 }
 0x12e   : > { %1161 = vst [vmem:[%s1921_s10 + $0x70] sm:$0xff] %v1077_v28  ;;  %v919_v32 = vadd.f32 %v1408_v29, %v1914_v34  ;;  %v1521_v35 = vpop.f32.mrf.mxu1 }
 0x12f   : > { %v1410_v36 = vpop.f32.mrf.mxu0 }
 0x130   : > { %v1080_v37 = vadd.f32 %v1520_v33, %v919_v32  ;;  %v1411_v38 = vadd.f32 %v1410_v36, %v1409_v31  ;;  %v1522_v39 = vpop.f32.mrf.mxu1 }
 0x131   : > { %v1412_v40 = vpop.f32.mrf.mxu0  ;;  %v1523_v42 = vadd.f32 %v1522_v39, %v1521_v35 }
 0x132   : > { %1162 = vst [vmem:[%s1921_s10 + $0x78] sm:$0xff] %v1080_v37  ;;  %v924_v41 = vadd.f32 %v1411_v38, %v1914_v34  ;;  %v1524_v43 = vpop.f32.mrf.mxu1 }
 0x133   : > { %v1413_v44 = vpop.f32.mrf.mxu0 }
 0x134   : > { %v1085_v45 = vadd.f32 %v1523_v42, %v924_v41  ;;  %v1414_v46 = vadd.f32 %v1413_v44, %v1412_v40  ;;  %v1525_v47 = vpop.f32.mrf.mxu1 }
 0x135   : > { %v1415_v48 = vpop.f32.mrf.mxu0  ;;  %v1526_v50 = vadd.f32 %v1525_v47, %v1524_v43 }
 0x136   : > { %1163 = vst [vmem:[%s1921_s10 + $0x80] sm:$0xff] %v1085_v45  ;;  %v927_v49 = vadd.f32 %v1414_v46, %v1914_v34  ;;  %v1527_v51 = vpop.f32.mrf.mxu1 }
 0x137   : > { %v1416_v52 = vpop.f32.mrf.mxu0 }
 0x138   : > { %v1088_v53 = vadd.f32 %v1526_v50, %v927_v49  ;;  %v1417_v54 = vadd.f32 %v1416_v52, %v1415_v48  ;;  %v1528_v55 = vpop.f32.mrf.mxu1 }
 0x139   : > { %v1418_v56 = vpop.f32.mrf.mxu0  ;;  %v1529_v58 = vadd.f32 %v1528_v55, %v1527_v51 }
 0x13a   : > { %1164 = vst [vmem:[%s1921_s10 + $0x88] sm:$0xff] %v1088_v53  ;;  %v932_v57 = vadd.f32 %v1417_v54, %v1914_v34  ;;  %v1530_v59 = vpop.f32.mrf.mxu1 }
 0x13b   : > { %v1419_v60 = vpop.f32.mrf.mxu0 }
 0x13c   : > { %v1093_v61 = vadd.f32 %v1529_v58, %v932_v57  ;;  %v1420_v62 = vadd.f32 %v1419_v60, %v1418_v56  ;;  %v1531_v63 = vpop.f32.mrf.mxu1 }
 0x13d   : > { %v1421_v0 = vpop.f32.mrf.mxu0  ;;  %v1532_v2 = vadd.f32 %v1531_v63, %v1530_v59 }
 0x13e   : > { %1165 = vst [vmem:[%s1921_s10 + $0x90] sm:$0xff] %v1093_v61  ;;  %v935_v1 = vadd.f32 %v1420_v62, %v1914_v34  ;;  %v1533_v3 = vpop.f32.mrf.mxu1 }
 0x13f   : > { %v1422_v4 = vpop.f32.mrf.mxu0 }
 0x140   : > { %v1096_v5 = vadd.f32 %v1532_v2, %v935_v1  ;;  %v1423_v6 = vadd.f32 %v1422_v4, %v1421_v0  ;;  %v1534_v7 = vpop.f32.mrf.mxu1 }
 0x141   : > { %v1424_v8 = vpop.f32.mrf.mxu0  ;;  %v1535_v10 = vadd.f32 %v1534_v7, %v1533_v3 }
 0x142   : > { %1166 = vst [vmem:[%s1921_s10 + $0x98] sm:$0xff] %v1096_v5  ;;  %v940_v9 = vadd.f32 %v1423_v6, %v1914_v34  ;;  %v1536_v11 = vpop.f32.mrf.mxu1 }
 0x143   : > { %v1425_v12 = vpop.f32.mrf.mxu0 }
 0x144   : > { %v1101_v13 = vadd.f32 %v1535_v10, %v940_v9  ;;  %v1426_v14 = vadd.f32 %v1425_v12, %v1424_v8  ;;  %v1537_v15 = vpop.f32.mrf.mxu1 }
 0x145   : > { %v1427_v16 = vpop.f32.mrf.mxu0  ;;  %v1538_v18 = vadd.f32 %v1537_v15, %v1536_v11 }
 0x146   : > { %1167 = vst [vmem:[%s1921_s10 + $0xa0] sm:$0xff] %v1101_v13  ;;  %v943_v17 = vadd.f32 %v1426_v14, %v1914_v34  ;;  %v1539_v19 = vpop.f32.mrf.mxu1 }
 0x147   : > { %v1428_v20 = vpop.f32.mrf.mxu0 }
 0x148   : > { %v1104_v21 = vadd.f32 %v1538_v18, %v943_v17  ;;  %v1429_v22 = vadd.f32 %v1428_v20, %v1427_v16  ;;  %v1540_v23 = vpop.f32.mrf.mxu1 }
 0x149   : > { %v1430_v24 = vpop.f32.mrf.mxu0  ;;  %v1541_v26 = vadd.f32 %v1540_v23, %v1539_v19 }
 0x14a   : > { %1168 = vst [vmem:[%s1921_s10 + $0xa8] sm:$0xff] %v1104_v21  ;;  %v948_v25 = vadd.f32 %v1429_v22, %v1914_v34  ;;  %v1542_v27 = vpop.f32.mrf.mxu1 }
 0x14b   : > { %v1431_v28 = vpop.f32.mrf.mxu0 }
 0x14c   : > { %v1109_v29 = vadd.f32 %v1541_v26, %v948_v25  ;;  %v1432_v30 = vadd.f32 %v1431_v28, %v1430_v24  ;;  %v1543_v31 = vpop.f32.mrf.mxu1 }
 0x14d   : > { %v1433_v32 = vpop.f32.mrf.mxu0  ;;  %v1544_v35 = vadd.f32 %v1543_v31, %v1542_v27 }
 0x14e   : > { %1169 = vst [vmem:[%s1921_s10 + $0xb0] sm:$0xff] %v1109_v29  ;;  %v951_v33 = vadd.f32 %v1432_v30, %v1914_v34  ;;  %v1545_v36 = vpop.f32.mrf.mxu1 }
 0x14f   : > { %v1434_v37 = vpop.f32.mrf.mxu0 }
 0x150   : > { %v1112_v38 = vadd.f32 %v1544_v35, %v951_v33  ;;  %v1435_v39 = vadd.f32 %v1434_v37, %v1433_v32  ;;  %v1546_v40 = vpop.f32.mrf.mxu1 }
 0x151   : > { %v1436_v41 = vpop.f32.mrf.mxu0  ;;  %v1547_v43 = vadd.f32 %v1546_v40, %v1545_v36 }
 0x152   : > { %1170 = vst [vmem:[%s1921_s10 + $0xb8] sm:$0xff] %v1112_v38  ;;  %v956_v42 = vadd.f32 %v1435_v39, %v1914_v34  ;;  %v1548_v44 = vpop.f32.mrf.mxu1 }
 0x153   : > { %v1437_v45 = vpop.f32.mrf.mxu0 }
 0x154   : > { %v1117_v46 = vadd.f32 %v1547_v43, %v956_v42  ;;  %v1438_v47 = vadd.f32 %v1437_v45, %v1436_v41  ;;  %v1549_v48 = vpop.f32.mrf.mxu1 }
 0x155   : > { %v1439_v49 = vpop.f32.mrf.mxu0  ;;  %v1550_v51 = vadd.f32 %v1549_v48, %v1548_v44 }
 0x156   : > { %1171 = vst [vmem:[%s1921_s10 + $0xc0] sm:$0xff] %v1117_v46  ;;  %v959_v50 = vadd.f32 %v1438_v47, %v1914_v34  ;;  %v1551_v52 = vpop.f32.mrf.mxu1 }
 0x157   : > { %v1440_v53 = vpop.f32.mrf.mxu0 }
 0x158   : > { %v1120_v54 = vadd.f32 %v1550_v51, %v959_v50  ;;  %v1441_v55 = vadd.f32 %v1440_v53, %v1439_v49  ;;  %v1552_v56 = vpop.f32.mrf.mxu1 }
 0x159   : > { %v1442_v57 = vpop.f32.mrf.mxu0  ;;  %v1553_v59 = vadd.f32 %v1552_v56, %v1551_v52 }
 0x15a   : > { %1172 = vst [vmem:[%s1921_s10 + $0xc8] sm:$0xff] %v1120_v54  ;;  %v964_v58 = vadd.f32 %v1441_v55, %v1914_v34  ;;  %v1554_v60 = vpop.f32.mrf.mxu1 }
 0x15b   : > { %v1443_v61 = vpop.f32.mrf.mxu0 }
 0x15c   : > { %v1125_v62 = vadd.f32 %v1553_v59, %v964_v58  ;;  %v1444_v63 = vadd.f32 %v1443_v61, %v1442_v57  ;;  %v1555_v0 = vpop.f32.mrf.mxu1 }
 0x15d   : > { %v1445_v1 = vpop.f32.mrf.mxu0  ;;  %v1556_v3 = vadd.f32 %v1555_v0, %v1554_v60 }
 0x15e   : > { %1173 = vst [vmem:[%s1921_s10 + $0xd0] sm:$0xff] %v1125_v62  ;;  %v967_v2 = vadd.f32 %v1444_v63, %v1914_v34  ;;  %v1557_v4 = vpop.f32.mrf.mxu1 }
 0x15f   : > { %v1446_v5 = vpop.f32.mrf.mxu0 }
 0x160   : > { %v1128_v6 = vadd.f32 %v1556_v3, %v967_v2  ;;  %v1447_v7 = vadd.f32 %v1446_v5, %v1445_v1  ;;  %v1558_v8 = vpop.f32.mrf.mxu1 }
 0x161   : > { %v1448_v9 = vpop.f32.mrf.mxu0  ;;  %v1559_v11 = vadd.f32 %v1558_v8, %v1557_v4 }
 0x162   : > { %1174 = vst [vmem:[%s1921_s10 + $0xd8] sm:$0xff] %v1128_v6  ;;  %v972_v10 = vadd.f32 %v1447_v7, %v1914_v34  ;;  %v1560_v12 = vpop.f32.mrf.mxu1 }
 0x163   : > { %v1449_v13 = vpop.f32.mrf.mxu0 }
 0x164   : > { %v1133_v14 = vadd.f32 %v1559_v11, %v972_v10  ;;  %v1450_v15 = vadd.f32 %v1449_v13, %v1448_v9  ;;  %v1561_v16 = vpop.f32.mrf.mxu1 }
 0x165   : > { %v1451_v17 = vpop.f32.mrf.mxu0  ;;  %v1562_v19 = vadd.f32 %v1561_v16, %v1560_v12 }
 0x166   : > { %1175 = vst [vmem:[%s1921_s10 + $0xe0] sm:$0xff] %v1133_v14  ;;  %v975_v18 = vadd.f32 %v1450_v15, %v1914_v34  ;;  %v1563_v20 = vpop.f32.mrf.mxu1 }
 0x167   : > { %v1452_v21 = vpop.f32.mrf.mxu0 }
 0x168   : > { %v1136_v22 = vadd.f32 %v1562_v19, %v975_v18  ;;  %v1453_v23 = vadd.f32 %v1452_v21, %v1451_v17  ;;  %v1564_v24 = vpop.f32.mrf.mxu1 }
 0x169   : > { %v1454_v25 = vpop.f32.mrf.mxu0  ;;  %v1565_v27 = vadd.f32 %v1564_v24, %v1563_v20 }
 0x16a   : > { %1176 = vst [vmem:[%s1921_s10 + $0xe8] sm:$0xff] %v1136_v22  ;;  %v980_v26 = vadd.f32 %v1453_v23, %v1914_v34  ;;  %v1566_v28 = vpop.f32.mrf.mxu1 }
 0x16b   : > { %v1455_v29 = vpop.f32.mrf.mxu0 }
 0x16c   : > { %v1141_v30 = vadd.f32 %v1565_v27, %v980_v26  ;;  %v1456_v31 = vadd.f32 %v1455_v29, %v1454_v25  ;;  %v1567_v32 = vpop.f32.mrf.mxu1 }
 0x16d   : > { %v1568_v35 = vadd.f32 %v1567_v32, %v1566_v28 }
 0x16e   : > { %1177 = vst [vmem:[%s1921_s10 + $0xf0] sm:$0xff] %v1141_v30  ;;  %v983_v33 = vadd.f32 %v1456_v31, %v1914_v34 }
 0x170   : > { %v1144_v36 = vadd.f32 %v1568_v35, %v983_v33 }
 0x172   : > { %1178 = vst [vmem:[%s1921_s10 + $0xf8] sm:$0xff] %v1144_v36 }
 0x173 PF: > { %s13_s12 = sadd.s32 1, %s1711_s12  }
 0x174   : > { %p10_p4 = scmp.ge.s32.totalorder %s13_s12, 4  }
 0x176   :  { %12 = sbr.rel (!%p10_p4) target bundleno = 1 (0x1), region = 62 }

// kernel: gcn_forward.4
= control target key start
LH: loop header
LB: loop body
LE: loop exit
PB: predicated region body
PF: predicated region fallthrough
CT: control target
= control target key end

     0   :  { %s2429_s15 = smov 0   ;;  %s2727_s0 = inlined_call_operand.vmem [shape: bf16[512,512], index: 0, kind: input, shape index: {}]   ;;  %s2728_s1 = inlined_call_operand.vmem [shape: bf16[512,128], index: 1, kind: input, shape index: {}]   ;;  %s2729_s2 = inlined_call_operand.vmem [shape: f32[1,128], index: 2, kind: input, shape index: {}]   ;;  %s2730_s3 = inlined_call_operand.vmem [shape: bf16[128,128], index: 3, kind: input, shape index: {}]   ;;  %s2731_s4 = inlined_call_operand.vmem [shape: bf16[512,128], index: 4, kind: output, shape index: {}]  }
   0x1 LB: > { %s1663_s16 = sadd.s32 4294967295, %s2402_s15   ;;  %p1667_p0 = scmp.ge.s32.totalorder %s2402_s15, 1  ;;  %s2402_s15 = sphi %s2429_s15, %s14_s15  }
   0x2   : > { %p164_p1 = scmp.lt.s32.totalorder %s2402_s15, 3 }
   0x4   : > { %p165_p2 = pnand %p1667_p0, %p164_p1 }
   0x5   : > { %s1668_s19 = sshll.u32 (!%p165_p2), %s1663_s16, 5 }
   0x6   : > { %168 = sbr.rel (%p165_p2) target bundleno = 605 (0x25d), region = 36  ;;  %p192_p3 = scmp.lt.s32.totalorder (!%p165_p2), %s1668_s19, 63 }
   0xb   : > { %v2260_v0 = vld [vmem:[%s2728_s1 + $0x78] sm:$0xff]   ;;  %v2262_v2 = vld [vmem:[%s2728_s1 + $0x70] sm:$0xff]   ;;  %v2264_v4 = vld [vmem:[%s2728_s1 + $0x68] sm:$0xff]   ;;  %s2733_s19 = smov (!%p192_p3, %s1668_s19), 63 }
   0xc   : > { %v2261_v1 = vld [vmem:[%s2728_s1 + $0x38] sm:$0xff]   ;;  %2236 = vmatprep.subr.bf16.mxu1 %v2260_v0  ;;  %1940 = vmatprep.subr.bf16.mxu0 %v2260_v0  ;;  %v2263_v3 = vld [vmem:[%s2728_s1 + $0x30] sm:$0xff]   ;;  %v2265_v5 = vld [vmem:[%s2728_s1 + $0x28] sm:$0xff]   ;;  %s1812_s8 = sshll.u32 %s2733_s19, 4  ;;  %s1672_s7 = sshll.u32 %s2733_s19, 2 }
   0xd   : > { %2244 = vmatpush3.bf16.msra.mxu1 %v2261_v1  ;;  %1941 = vmatpush3.bf16.msra.mxu0 %v2261_v1  ;;  %v2266_v6 = vld [vmem:[%s2728_s1 + $0x60] sm:$0xff]   ;;  %v2268_v8 = vld [vmem:[%s2728_s1 + $0x58] sm:$0xff]   ;;  %s2470_s13 = scalar_lea.vmem %s2727_s0, %s1812_s8  ;;  %v2270_v10 = vld [vmem:[%s2728_s1 + $0x50] sm:$0xff]   ;;  %s2706_s10 = scalar_lea.vmem %s2731_s4, %s1672_s7 }
   0xe   : > { %2237 = vmatprep.subr.bf16.mxu1 %v2262_v2  ;;  %1942 = vmatprep.subr.bf16.mxu0 %v2262_v2  ;;  %v2267_v7 = vld [vmem:[%s2728_s1 + $0x20] sm:$0xff]   ;;  %v2269_v9 = vld [vmem:[%s2728_s1 + $0x18] sm:$0xff]   ;;  %v2271_v12 = vld [vmem:[%s2728_s1 + $0x10] sm:$0xff]  }
   0xf   : > { %v2278_v11 = vld [vmem:[%s2470_s13 + $0x184] ss:$16 sps:$4 sm:$0xff]   ;;  %v2272_v13 = vld [vmem:[%s2728_s1 + $0x48] sm:$0xff]   ;;  %v2279_v17 = vld [vmem:[%s2728_s1 + $0xf8] sm:$0xff]  }
  0x10   : > { %980 = vmatprep.mubr.bf16.mxu1 %v2278_v11  ;;  %v2273_v14 = vld [vmem:[%s2728_s1 + $0x8] sm:$0xff]   ;;  %v2274_v15 = vld [vmem:[%s2728_s1 + $0x40] sm:$0xff]   ;;  %v2280_v19 = vld [vmem:[%s2728_s1 + $0xb8] sm:$0xff]  }
  0x11   : > { %2245 = vmatpush3.bf16.msra.mxu1 %v2263_v3  ;;  %1943 = vmatpush3.bf16.msra.mxu0 %v2263_v3  ;;  %v2275_v16 = vld [vmem:[%s2728_s1] sm:$0xff]   ;;  %v2281_v21 = vld [vmem:[%s2728_s1 + $0xf0] sm:$0xff]   ;;  %v2286_v24 = vld [vmem:[%s2728_s1 + $0xe8] sm:$0xff]  }
  0x12   : > { %2238 = vmatprep.subr.bf16.mxu1 %v2264_v4  ;;  %1944 = vmatprep.subr.bf16.mxu0 %v2264_v4  ;;  %v2276_v18 = vld [vmem:[%s2470_s13 + $0x180] ss:$16 sps:$4 sm:$0xff]   ;;  %v2283_v20 = vld [vmem:[%s2470_s13 + $0x1a4] ss:$16 sps:$4 sm:$0xff]   ;;  %v2287_v27 = vld [vmem:[%s2728_s1 + $0xa8] sm:$0xff]  }
  0x13   : > { %v2282_v22 = vld [vmem:[%s2728_s1 + $0xb0] sm:$0xff]   ;;  %v2288_v28 = vld [vmem:[%s2728_s1 + $0xe0] sm:$0xff]   ;;  %v2293_v32 = vld [vmem:[%s2728_s1 + $0xd8] sm:$0xff]  }
  0x14   : > { %v2285_v23 = vld [vmem:[%s2470_s13 + $0x1a0] ss:$16 sps:$4 sm:$0xff]   ;;  %v2305_v26 = vld [vmem:[%s2470_s13 + $0x4] ss:$16 sps:$4 sm:$0xff]   ;;  %v2294_v36 = vld [vmem:[%s2728_s1 + $0x98] sm:$0xff]  }
  0x15   : > { %2246 = vmatpush3.bf16.msra.mxu1 %v2265_v5  ;;  %1945 = vmatpush3.bf16.msra.mxu0 %v2265_v5  ;;  %v2303_v25 = vld [vmem:[%s2470_s13] ss:$16 sps:$4 sm:$0xff]   ;;  %v2290_v29 = vld [vmem:[%s2470_s13 + $0x1c4] ss:$16 sps:$4 sm:$0xff]   ;;  %v2300_v40 = vld [vmem:[%s2728_s1 + $0xc8] sm:$0xff]  }
  0x16   : > { %2239 = vmatprep.subr.bf16.mxu1 %v2266_v6  ;;  %1946 = vmatprep.subr.bf16.mxu0 %v2266_v6  ;;  %v2310_v30 = vld [vmem:[%s2470_s13 + $0x24] ss:$16 sps:$4 sm:$0xff]   ;;  %v2312_v33 = vld [vmem:[%s2470_s13 + $0x20] ss:$16 sps:$4 sm:$0xff]   ;;  %v2301_v44 = vld [vmem:[%s2728_s1 + $0x88] sm:$0xff]  }
  0x17   : > { %884 = vmatprep.mubr.bf16.mxu0 %v2305_v26  ;;  %v2289_v31 = vld [vmem:[%s2728_s1 + $0xa0] sm:$0xff]   ;;  %v2295_v38 = vld [vmem:[%s2728_s1 + $0xd0] sm:$0xff]   ;;  %v2309_v45 = vld [vmem:[%s2470_s13 + $0xc] ss:$16 sps:$4 sm:$0xff]  }
  0x18   : > { %v2316_v34 = vld [vmem:[%s2470_s13 + $0x44] ss:$16 sps:$4 sm:$0xff]   ;;  %v2292_v35 = vld [vmem:[%s2470_s13 + $0x1c0] ss:$16 sps:$4 sm:$0xff]   ;;  %v2307_v50 = vld [vmem:[%s2470_s13 + $0x8] ss:$16 sps:$4 sm:$0xff]  }
  0x19   : > { %2247 = vmatpush3.bf16.msra.mxu1 %v2267_v7  ;;  %1947 = vmatpush3.bf16.msra.mxu0 %v2267_v7  ;;  %v2297_v37 = vld [vmem:[%s2470_s13 + $0x1e4] ss:$16 sps:$4 sm:$0xff]   ;;  %v2318_v41 = vld [vmem:[%s2470_s13 + $0x40] ss:$16 sps:$4 sm:$0xff]   ;;  %v2313_v51 = vld [vmem:[%s2470_s13 + $0x2c] ss:$16 sps:$4 sm:$0xff]  }
  0x1a   : > { %2240 = vmatprep.subr.bf16.mxu1 %v2268_v8  ;;  %1948 = vmatprep.subr.bf16.mxu0 %v2268_v8  ;;  %v2296_v39 = vld [vmem:[%s2728_s1 + $0x90] sm:$0xff]   ;;  %v2302_v46 = vld [vmem:[%s2728_s1 + $0xc0] sm:$0xff]   ;;  %v2315_v54 = vld [vmem:[%s2470_s13 + $0x28] ss:$16 sps:$4 sm:$0xff]  }
  0x1b   : > { %v2322_v42 = vld [vmem:[%s2470_s13 + $0x64] ss:$16 sps:$4 sm:$0xff]   ;;  %v2299_v43 = vld [vmem:[%s2470_s13 + $0x1e0] ss:$16 sps:$4 sm:$0xff]   ;;  %v2319_v55 = vld [vmem:[%s2470_s13 + $0x4c] ss:$16 sps:$4 sm:$0xff]  }
  0x1c   : > { %v2306_v47 = vld [vmem:[%s2728_s1 + $0x80] sm:$0xff]   ;;  %v2321_v58 = vld [vmem:[%s2470_s13 + $0x48] ss:$16 sps:$4 sm:$0xff]   ;;  %v2325_v59 = vld [vmem:[%s2470_s13 + $0x6c] ss:$16 sps:$4 sm:$0xff]  }
  0x1d   : > { %2248 = vmatpush3.bf16.msra.mxu1 %v2269_v9  ;;  %1949 = vmatpush3.bf16.msra.mxu0 %v2269_v9  ;;  %v2324_v48 = vld [vmem:[%s2470_s13 + $0x60] ss:$16 sps:$4 sm:$0xff]   ;;  %v2328_v49 = vld [vmem:[%s2470_s13 + $0x84] ss:$16 sps:$4 sm:$0xff]   ;;  %v2327_v62 = vld [vmem:[%s2470_s13 + $0x68] ss:$16 sps:$4 sm:$0xff]  }
  0x1e   : > { %2241 = vmatprep.subr.bf16.mxu1 %v2270_v10  ;;  %1950 = vmatprep.subr.bf16.mxu0 %v2270_v10  ;;  %v2330_v52 = vld [vmem:[%s2470_s13 + $0x80] ss:$16 sps:$4 sm:$0xff]   ;;  %v2334_v53 = vld [vmem:[%s2470_s13 + $0xa4] ss:$16 sps:$4 sm:$0xff]   ;;  %v2331_v63 = vld [vmem:[%s2470_s13 + $0x8c] ss:$16 sps:$4 sm:$0xff]  }
  0x1f   : > { %v2336_v56 = vld [vmem:[%s2470_s13 + $0xa0] ss:$16 sps:$4 sm:$0xff]   ;;  %v2340_v57 = vld [vmem:[%s2470_s13 + $0xc4] ss:$16 sps:$4 sm:$0xff]   ;;  %v2333_v2 = vld [vmem:[%s2470_s13 + $0x88] ss:$16 sps:$4 sm:$0xff]  }
  0x20   : > { %v2342_v60 = vld [vmem:[%s2470_s13 + $0xc0] ss:$16 sps:$4 sm:$0xff]   ;;  %v2346_v61 = vld [vmem:[%s2470_s13 + $0xe4] ss:$16 sps:$4 sm:$0xff]   ;;  %v2337_v3 = vld [vmem:[%s2470_s13 + $0xac] ss:$16 sps:$4 sm:$0xff]  }
  0x21   : > { %2249 = vmatpush3.bf16.msra.mxu1 %v2271_v12  ;;  %1951 = vmatpush3.bf16.msra.mxu0 %v2271_v12  ;;  %v2348_v0 = vld [vmem:[%s2470_s13 + $0xe0] ss:$16 sps:$4 sm:$0xff]   ;;  %v2352_v1 = vld [vmem:[%s2470_s13 + $0x104] ss:$16 sps:$4 sm:$0xff]   ;;  %v2339_v6 = vld [vmem:[%s2470_s13 + $0xa8] ss:$16 sps:$4 sm:$0xff]  }
  0x22   : > { %2242 = vmatprep.subr.bf16.mxu1 %v2272_v13  ;;  %1952 = vmatprep.subr.bf16.mxu0 %v2272_v13  ;;  %v2354_v4 = vld [vmem:[%s2470_s13 + $0x100] ss:$16 sps:$4 sm:$0xff]   ;;  %v2358_v5 = vld [vmem:[%s2470_s13 + $0x124] ss:$16 sps:$4 sm:$0xff]   ;;  %v2343_v7 = vld [vmem:[%s2470_s13 + $0xcc] ss:$16 sps:$4 sm:$0xff]  }
  0x23   : > { %v2360_v8 = vld [vmem:[%s2470_s13 + $0x120] ss:$16 sps:$4 sm:$0xff]   ;;  %v2364_v9 = vld [vmem:[%s2470_s13 + $0x144] ss:$16 sps:$4 sm:$0xff]   ;;  %v2345_v10 = vld [vmem:[%s2470_s13 + $0xc8] ss:$16 sps:$4 sm:$0xff]  }
  0x24   : > { %v2349_v11 = vld [vmem:[%s2470_s13 + $0xec] ss:$16 sps:$4 sm:$0xff]   ;;  %v2366_v13 = vld [vmem:[%s2470_s13 + $0x140] ss:$16 sps:$4 sm:$0xff]  }
  0x25   : > { %2250 = vmatpush3.bf16.msra.mxu1 %v2273_v14  ;;  %1953 = vmatpush3.bf16.msra.mxu0 %v2273_v14  ;;  %v2388_v12 = vld [vmem:[%s2730_s3 + $0x38] sm:$0xff]   ;;  %v2370_v14 = vld [vmem:[%s2470_s13 + $0x164] ss:$16 sps:$4 sm:$0xff]  }
  0x26   : > { %2243 = vmatprep.subr.bf16.mxu1 %v2274_v15  ;;  %1954 = vmatprep.subr.bf16.mxu0 %v2274_v15  ;;  %v2351_v15 = vld [vmem:[%s2470_s13 + $0xe8] ss:$16 sps:$4 sm:$0xff]   ;;  %v2393_v26 = vld [vmem:[%s2730_s3 + $0x10] sm:$0xff]  }
  0x29   : > { %2251 = vmatpush3.bf16.msra.mxu1 %v2275_v16  ;;  %1955 = vmatpush3.bf16.msra.mxu0 %v2275_v16  ;;  %v2355_v16 = vld [vmem:[%s2470_s13 + $0x10c] ss:$16 sps:$4 sm:$0xff]  }
  0x2a   : > { %2052 = vmatprep.subr.bf16.mxu1 %v2279_v17  ;;  %2188 = vmatprep.subr.bf16.mxu0 %v2388_v12  ;;  %v2389_v17 = vld [vmem:[%s2730_s3 + $0x30] sm:$0xff]  }
  0x2c   : > { %981 = vmatmul.mubr.bf16.vlgmr.msra.gmra.mxu1 %v2276_v18  ;;  %885 = vmatmul.mubr.bf16.vlgmr.msra.gmra.mxu0 %v2303_v25  ;;  %v2372_v18 = vld [vmem:[%s2470_s13 + $0x160] ss:$16 sps:$4 sm:$0xff]   ;;  %v2392_v25 = vld [vmem:[%s2730_s3 + $0x18] sm:$0xff]  }
  0x2d   : > { %2053 = vmatpush3.bf16.msra.mxu1 %v2280_v19  ;;  %988 = vmatprep.mubr.bf16.mxu1 %v2283_v20  ;;  %v2357_v19 = vld [vmem:[%s2470_s13 + $0x108] ss:$16 sps:$4 sm:$0xff]   ;;  %v2361_v20 = vld [vmem:[%s2470_s13 + $0x12c] ss:$16 sps:$4 sm:$0xff]  }
  0x2e   : > { %2054 = vmatprep.subr.bf16.mxu1 %v2281_v21  ;;  %892 = vmatprep.mubr.bf16.mxu0 %v2310_v30  ;;  %v2390_v21 = vld [vmem:[%s2730_s3 + $0x28] sm:$0xff]   ;;  %v2395_v30 = vld [vmem:[%s2730_s3] sm:$0xff]  }
  0x2f   : > { %2189 = vmatpush3.bf16.msra.mxu0 %v2388_v12 }
  0x30   : > { %2190 = vmatprep.subr.bf16.mxu0 %v2389_v17 }
  0x31   : > { %2055 = vmatpush3.bf16.msra.mxu1 %v2282_v22  ;;  %v2391_v22 = vld [vmem:[%s2730_s3 + $0x20] sm:$0xff]  }
  0x32   : > { %2056 = vmatprep.subr.bf16.mxu1 %v2286_v24  ;;  %v2367_v24 = vld [vmem:[%s2470_s13 + $0x14c] ss:$16 sps:$4 sm:$0xff]  }
  0x33   : > { %2191 = vmatpush3.bf16.msra.mxu0 %v2389_v17  ;;  %v2648_v17 = vld [vmem:[%s2729_s2] ss:$0 sm:$0xff] }
  0x34   : > { %989 = vmatmul.mubr.bf16.gmra.mxu1 %v2285_v23  ;;  %893 = vmatmul.mubr.bf16.gmra.mxu0 %v2312_v33  ;;  %v2363_v23 = vld [vmem:[%s2470_s13 + $0x128] ss:$16 sps:$4 sm:$0xff]  }
  0x35   : > { %2057 = vmatpush3.bf16.msra.mxu1 %v2287_v27  ;;  %996 = vmatprep.mubr.bf16.mxu1 %v2290_v29  ;;  %v2369_v27 = vld [vmem:[%s2470_s13 + $0x148] ss:$16 sps:$4 sm:$0xff]  }
  0x36   : > { %2058 = vmatprep.subr.bf16.mxu1 %v2288_v28  ;;  %900 = vmatprep.mubr.bf16.mxu0 %v2316_v34  ;;  %v2373_v28 = vld [vmem:[%s2470_s13 + $0x16c] ss:$16 sps:$4 sm:$0xff]   ;;  %v2378_v33 = vld [vmem:[%s2470_s13 + $0x188] ss:$16 sps:$4 sm:$0xff]  }
  0x37   : > { %2192 = vmatprep.subr.bf16.mxu0 %v2390_v21  ;;  %v2394_v29 = vld [vmem:[%s2730_s3 + $0x8] sm:$0xff]  }
  0x38   : > { %2193 = vmatpush3.bf16.msra.mxu0 %v2390_v21  ;;  %v2379_v34 = vld [vmem:[%s2470_s13 + $0x1ac] ss:$16 sps:$4 sm:$0xff]  }
  0x39   : > { %2059 = vmatpush3.bf16.msra.mxu1 %v2289_v31  ;;  %2194 = vmatprep.subr.bf16.mxu0 %v2391_v22  ;;  %v2375_v31 = vld [vmem:[%s2470_s13 + $0x168] ss:$16 sps:$4 sm:$0xff]  }
  0x3a   : > { %2060 = vmatprep.subr.bf16.mxu1 %v2293_v32  ;;  %v2376_v32 = vld [vmem:[%s2470_s13 + $0x18c] ss:$16 sps:$4 sm:$0xff]  }
  0x3c   : > { %997 = vmatmul.mubr.bf16.gmra.mxu1 %v2292_v35  ;;  %901 = vmatmul.mubr.bf16.gmra.mxu0 %v2318_v41  ;;  %v2381_v35 = vld [vmem:[%s2470_s13 + $0x1a8] ss:$16 sps:$4 sm:$0xff]  }
  0x3d   : > { %2061 = vmatpush3.bf16.msra.mxu1 %v2294_v36  ;;  %1004 = vmatprep.mubr.bf16.mxu1 %v2297_v37  ;;  %v2382_v36 = vld [vmem:[%s2470_s13 + $0x1cc] ss:$16 sps:$4 sm:$0xff]   ;;  %v2384_v37 = vld [vmem:[%s2470_s13 + $0x1c8] ss:$16 sps:$4 sm:$0xff]  }
  0x3e   : > { %2062 = vmatprep.subr.bf16.mxu1 %v2295_v38  ;;  %908 = vmatprep.mubr.bf16.mxu0 %v2322_v42  ;;  %v2385_v38 = vld [vmem:[%s2470_s13 + $0x1ec] ss:$16 sps:$4 sm:$0xff]  }
  0x3f   : > { %2195 = vmatpush3.bf16.msra.mxu0 %v2391_v22 }
  0x40   : > { %2196 = vmatprep.subr.bf16.mxu0 %v2392_v25 }
  0x41   : > { %2063 = vmatpush3.bf16.msra.mxu1 %v2296_v39  ;;  %v2387_v39 = vld [vmem:[%s2470_s13 + $0x1e8] ss:$16 sps:$4 sm:$0xff]  }
  0x42   : > { %2064 = vmatprep.subr.bf16.mxu1 %v2300_v40 }
  0x43   : > { %2197 = vmatpush3.bf16.msra.mxu0 %v2392_v25 }
  0x44   : > { %1005 = vmatmul.mubr.bf16.gmra.mxu1 %v2299_v43  ;;  %909 = vmatmul.mubr.bf16.gmra.mxu0 %v2324_v48 }
  0x45   : > { %2065 = vmatpush3.bf16.msra.mxu1 %v2301_v44  ;;  %1045 = vmatprep.mubr.bf16.mxu1 %v2309_v45 }
  0x46   : > { %2066 = vmatprep.subr.bf16.mxu1 %v2302_v46  ;;  %916 = vmatprep.mubr.bf16.mxu0 %v2328_v49 }
  0x47   : > { %2198 = vmatprep.subr.bf16.mxu0 %v2393_v26 }
  0x48   : > { %2199 = vmatpush3.bf16.msra.mxu0 %v2393_v26 }
  0x49   : > { %2067 = vmatpush3.bf16.msra.mxu1 %v2306_v47  ;;  %2200 = vmatprep.subr.bf16.mxu0 %v2394_v29 }
  0x4c   : > { %1046 = vmatmul.mubr.bf16.vlgmr.msra.gmra.mxu1 %v2307_v50  ;;  %917 = vmatmul.mubr.bf16.gmra.mxu0 %v2330_v52 }
  0x4d   : > { %1053 = vmatprep.mubr.bf16.mxu1 %v2313_v51  ;;  %924 = vmatprep.mubr.bf16.mxu0 %v2334_v53 }
  0x4e   : > { %2201 = vmatpush3.bf16.msra.mxu0 %v2394_v29 }
  0x4f   : > { %2202 = vmatprep.subr.bf16.mxu0 %v2395_v30 }
  0x52   : > { %2203 = vmatpush3.bf16.msra.mxu0 %v2395_v30 }
  0x54   : > { %1054 = vmatmul.mubr.bf16.gmra.mxu1 %v2315_v54  ;;  %925 = vmatmul.mubr.bf16.gmra.mxu0 %v2336_v56 }
  0x55   : > { %1061 = vmatprep.mubr.bf16.mxu1 %v2319_v55  ;;  %932 = vmatprep.mubr.bf16.mxu0 %v2340_v57 }
  0x5c   : > { %1062 = vmatmul.mubr.bf16.gmra.mxu1 %v2321_v58  ;;  %933 = vmatmul.mubr.bf16.gmra.mxu0 %v2342_v60 }
  0x5d   : > { %1069 = vmatprep.mubr.bf16.mxu1 %v2325_v59  ;;  %940 = vmatprep.mubr.bf16.mxu0 %v2346_v61 }
  0x64   : > { %1070 = vmatmul.mubr.bf16.gmra.mxu1 %v2327_v62  ;;  %941 = vmatmul.mubr.bf16.gmra.mxu0 %v2348_v0 }
  0x65   : > { %1077 = vmatprep.mubr.bf16.mxu1 %v2331_v63  ;;  %948 = vmatprep.mubr.bf16.mxu0 %v2352_v1 }
  0x6c   : > { %1078 = vmatmul.mubr.bf16.gmra.mxu1 %v2333_v2  ;;  %949 = vmatmul.mubr.bf16.gmra.mxu0 %v2354_v4 }
  0x6d   : > { %1085 = vmatprep.mubr.bf16.mxu1 %v2337_v3  ;;  %956 = vmatprep.mubr.bf16.mxu0 %v2358_v5 }
  0x74   : > { %1086 = vmatmul.mubr.bf16.gmra.mxu1 %v2339_v6  ;;  %957 = vmatmul.mubr.bf16.gmra.mxu0 %v2360_v8 }
  0x75   : > { %1093 = vmatprep.mubr.bf16.mxu1 %v2343_v7  ;;  %964 = vmatprep.mubr.bf16.mxu0 %v2364_v9 }
  0x7c   : > { %1094 = vmatmul.mubr.bf16.gmra.mxu1 %v2345_v10  ;;  %965 = vmatmul.mubr.bf16.gmra.mxu0 %v2366_v13 }
  0x7d   : > { %1101 = vmatprep.mubr.bf16.mxu1 %v2349_v11  ;;  %972 = vmatprep.mubr.bf16.mxu0 %v2370_v14 }
  0x84   : > { %1102 = vmatmul.mubr.bf16.gmra.mxu1 %v2351_v15  ;;  %973 = vmatmul.mubr.bf16.gmra.mxu0 %v2372_v18 }
  0x85   : > { %1109 = vmatprep.mubr.bf16.mxu1 %v2355_v16 }
  0x8c   : > { %1110 = vmatmul.mubr.bf16.gmra.mxu1 %v2357_v19 }
  0x8d   : > { %1117 = vmatprep.mubr.bf16.mxu1 %v2361_v20 }
  0x94   : > { %1118 = vmatmul.mubr.bf16.gmra.mxu1 %v2363_v23 }
  0x95   : > { %1125 = vmatprep.mubr.bf16.mxu1 %v2367_v24 }
  0x9c   : > { %1126 = vmatmul.mubr.bf16.gmra.mxu1 %v2369_v27 }
  0x9d   : > { %1133 = vmatprep.mubr.bf16.mxu1 %v2373_v28 }
  0xa4   : > { %1134 = vmatmul.mubr.bf16.gmra.mxu1 %v2375_v31 }
  0xa5   : > { %1141 = vmatprep.mubr.bf16.mxu1 %v2376_v32 }
  0xac   : > { %1142 = vmatmul.mubr.bf16.gmra.mxu1 %v2378_v33 }
  0xad   : > { %1149 = vmatprep.mubr.bf16.mxu1 %v2379_v34 }
  0xb4   : > { %1150 = vmatmul.mubr.bf16.gmra.mxu1 %v2381_v35 }
  0xb5   : > { %1157 = vmatprep.mubr.bf16.mxu1 %v2382_v36 }
  0xbc   : > { %1158 = vmatmul.mubr.bf16.gmra.mxu1 %v2384_v37 }
  0xbd   : > { %1165 = vmatprep.mubr.bf16.mxu1 %v2385_v38 }
  0xc4   : > { %1166 = vmatmul.mubr.bf16.gmra.mxu1 %v2387_v39 }
  0xec   : > { %v2028_v40 = vpop.f32.mrf.mxu1  ;;  %v1956_v45 = vpop.f32.mrf.mxu0 }
  0xee   : > { %v2029_v41 = vpop.f32.mrf.mxu1  ;;  %v1957_v48 = vpop.f32.mrf.mxu0 }
  0xef   : > { %v2629_v42 = vadd.f32 %v2029_v41, %v2028_v40  ;;  %v1958_v13 = vadd.f32 %v1957_v48, %v1956_v45 }
  0xf0   : > { %v2031_v43 = vpop.f32.mrf.mxu1  ;;  %v1959_v50 = vpop.f32.mrf.mxu0 }
  0xf1   : > { %v887_v20 = vadd.f32 %v1958_v13, %v2648_v17 }
  0xf2   : > { %v2032_v44 = vpop.f32.mrf.mxu1  ;;  %v1960_v53 = vpop.f32.mrf.mxu0 }
  0xf3   : > { %v2631_v46 = vadd.f32 %v2032_v44, %v2031_v43  ;;  %v1961_v16 = vadd.f32 %v1960_v53, %v1959_v50 }
  0xf4   : > { %v2034_v47 = vpop.f32.mrf.mxu1  ;;  %v1962_v55 = vpop.f32.mrf.mxu0 }
  0xf5   : > { %v890_v24 = vadd.f32 %v1961_v16, %v2648_v17 }
  0xf6   : > { %v2035_v49 = vpop.f32.mrf.mxu1  ;;  %v1963_v58 = vpop.f32.mrf.mxu0 }
  0xf7   : > { %v2633_v51 = vadd.f32 %v2035_v49, %v2034_v47  ;;  %v1964_v29 = vadd.f32 %v1963_v58, %v1962_v55 }
  0xf8   : > { %v2037_v52 = vpop.f32.mrf.mxu1  ;;  %v1965_v60 = vpop.f32.mrf.mxu0 }
  0xf9   : > { %v895_v38 = vadd.f32 %v1964_v29, %v2648_v17 }
  0xfa   : > { %v2038_v54 = vpop.f32.mrf.mxu1  ;;  %v1966_v63 = vpop.f32.mrf.mxu0 }
  0xfb   : > { %v2635_v56 = vadd.f32 %v2038_v54, %v2037_v52  ;;  %v1967_v33 = vadd.f32 %v1966_v63, %v1965_v60 }
  0xfc   : > { %v2040_v57 = vpop.f32.mrf.mxu1  ;;  %v1968_v1 = vpop.f32.mrf.mxu0 }
  0xfd   : > { %v898_v43 = vadd.f32 %v1967_v33, %v2648_v17 }
  0xfe   : > { %v2041_v59 = vpop.f32.mrf.mxu1  ;;  %v1969_v4 = vpop.f32.mrf.mxu0 }
  0xff   : > { %v2637_v61 = vadd.f32 %v2041_v59, %v2040_v57  ;;  %v1970_v50 = vadd.f32 %v1969_v4, %v1968_v1 }
 0x100   : > { %v2043_v62 = vpop.f32.mrf.mxu1  ;;  %v1971_v6 = vpop.f32.mrf.mxu0 }
 0x102   : > { %v2044_v0 = vpop.f32.mrf.mxu1  ;;  %v1972_v9 = vpop.f32.mrf.mxu0 }
 0x103   : > { %v2639_v2 = vadd.f32 %v2044_v0, %v2043_v62  ;;  %v1973_v55 = vadd.f32 %v1972_v9, %v1971_v6  ;;  %v903_v62 = vadd.f32 %v1970_v50, %v2648_v17 }
 0x104   : > { %v2046_v3 = vpop.f32.mrf.mxu1  ;;  %v1974_v11 = vpop.f32.mrf.mxu0 }
 0x106   : > { %v2047_v5 = vpop.f32.mrf.mxu1  ;;  %v1975_v15 = vpop.f32.mrf.mxu0 }
 0x107   : > { %v2641_v7 = vadd.f32 %v2047_v5, %v2046_v3 }
 0x108   : > { %v2049_v8 = vpop.f32.mrf.mxu1  ;;  %v1977_v19 = vpop.f32.mrf.mxu0 }
 0x10a   : > { %v2050_v10 = vpop.f32.mrf.mxu1  ;;  %v1978_v23 = vpop.f32.mrf.mxu0 }
 0x10b   : > { %v2643_v12 = vadd.f32 %v2050_v10, %v2049_v8  ;;  %v906_v8 = vadd.f32 %v1973_v55, %v2648_v17 }
 0x10c   : > { %v2068_v14 = vpop.f32.mrf.mxu1  ;;  %v2652_v26 = vpop.f32.mrf.mxu0 }
 0x10e   : > { %v2069_v18 = vpop.f32.mrf.mxu1  ;;  %v1981_v31 = vpop.f32.mrf.mxu0 }
 0x10f   : > { %v2070_v21 = vadd.f32 %v2069_v18, %v2068_v14  ;;  %v1976_v14 = vadd.f32 %v1975_v15, %v1974_v11  ;;  %v1979_v18 = vadd.f32 %v1978_v23, %v1977_v19  ;;  %v1982_v19 = vadd.f32 %v1981_v31, %v2652_v26 }
 0x110   : > { %v2071_v22 = vpop.f32.mrf.mxu1  ;;  %v1983_v35 = vpop.f32.mrf.mxu0 }
 0x111   : > { %v1048_v27 = vadd.f32 %v2070_v21, %v887_v20 }
 0x112   : > { %v2072_v25 = vpop.f32.mrf.mxu1  ;;  %v1984_v41 = vpop.f32.mrf.mxu0 }
 0x113   : > { %v2073_v28 = vadd.f32 %v2072_v25, %v2071_v22  ;;  %v1174_v36 = vmax.f32 %v1048_v27, 0.0  ;;  %v911_v25 = vadd.f32 %v1976_v14, %v2648_v17 }
 0x114   : > { %v2074_v30 = vpop.f32.mrf.mxu1  ;;  %v2656_v47 = vpop.f32.mrf.mxu0 }
 0x115   : > { %v1051_v32 = vadd.f32 %v2073_v28, %v890_v24 }
 0x116   : > { %v2075_v34 = vpop.f32.mrf.mxu1  ;;  %v1987_v53 = vpop.f32.mrf.mxu0 }
 0x117   : > { %v1175_v37 = vmax.f32 %v1051_v32, 0.0  ;;  %v2076_v39 = vadd.f32 %v2075_v34, %v2074_v30  ;;  %v914_v30 = vadd.f32 %v1979_v18, %v2648_v17  ;;  %v1988_v31 = vadd.f32 %v1987_v53, %v2656_v47 }
 0x118   : > { %v2077_v40 = vpop.f32.mrf.mxu1  ;;  %v1989_v58 = vpop.f32.mrf.mxu0 }
 0x119   : > { %v1206_v44 = vpack.c.bf16 %v1175_v37, %v1174_v36  ;;  %v1056_v48 = vadd.f32 %v2076_v39, %v895_v38  ;;  %v1985_v38 = vadd.f32 %v1984_v41, %v1983_v35 }
 0x11a   : > { %v2078_v45 = vpop.f32.mrf.mxu1  ;;  %v1990_v3 = vpop.f32.mrf.mxu0 }
 0x11b   : > { %v2079_v49 = vadd.f32 %v2078_v45, %v2077_v40  ;;  %2204 = vmatprep.mubr.bf16.mxu0 %v1206_v44  ;;  %v1176_v59 = vmax.f32 %v1056_v48, 0.0  ;;  %v919_v45 = vadd.f32 %v1982_v19, %v2648_v17 }
 0x11c   : > { %v2080_v52 = vpop.f32.mrf.mxu1  ;;  %v2660_v13 = vpop.f32.mrf.mxu0 }
 0x11d   : > { %v1059_v54 = vadd.f32 %v2079_v49, %v898_v43 }
 0x11e   : > { %v2081_v57 = vpop.f32.mrf.mxu1  ;;  %v1993_v9 = vpop.f32.mrf.mxu0 }
 0x11f   : > { %v1177_v60 = vmax.f32 %v1059_v54, 0.0  ;;  %v2082_v63 = vadd.f32 %v2081_v57, %v2080_v52  ;;  %v922_v52 = vadd.f32 %v1985_v38, %v2648_v17  ;;  %v1994_v53 = vadd.f32 %v1993_v9, %v2660_v13 }
 0x120   : > { %v2083_v0 = vpop.f32.mrf.mxu1  ;;  %v1995_v21 = vpop.f32.mrf.mxu0 }
 0x121   : > { %v1207_v5 = vpack.c.bf16 %v1177_v60, %v1176_v59  ;;  %v1064_v1 = vadd.f32 %v2082_v63, %v903_v62  ;;  %v1991_v62 = vadd.f32 %v1990_v3, %v1989_v58 }
 0x122   : > { %v2084_v10 = vpop.f32.mrf.mxu1  ;;  %v1996_v29 = vpop.f32.mrf.mxu0 }
 0x123   : > { %v2085_v4 = vadd.f32 %v2084_v10, %v2083_v0  ;;  %2205 = vmatmul.mubr.bf16.vlgmr.msra.gmra.mxu0 %v1207_v5  ;;  %v1178_v22 = vmax.f32 %v1064_v1, 0.0  ;;  %v927_v10 = vadd.f32 %v1988_v31, %v2648_v17 }
 0x124   : > { %v2086_v6 = vpop.f32.mrf.mxu1  ;;  %v2664_v34 = vpop.f32.mrf.mxu0 }
 0x125   : > { %v1067_v16 = vadd.f32 %v2085_v4, %v906_v8 }
 0x126   : > { %v2087_v20 = vpop.f32.mrf.mxu1  ;;  %v1999_v36 = vpop.f32.mrf.mxu0 }
 0x127   : > { %v1179_v24 = vmax.f32 %v1067_v16, 0.0  ;;  %v2088_v27 = vadd.f32 %v2087_v20, %v2086_v6  ;;  %v930_v6 = vadd.f32 %v1991_v62, %v2648_v17  ;;  %v2000_v13 = vadd.f32 %v1999_v36, %v2664_v34 }
 0x128   : > { %v2089_v28 = vpop.f32.mrf.mxu1  ;;  %v2001_v40 = vpop.f32.mrf.mxu0 }
 0x129   : > { %v1208_v32 = vpack.c.bf16 %v1179_v24, %v1178_v22  ;;  %v1072_v11 = vadd.f32 %v2088_v27, %v911_v25  ;;  %v1997_v25 = vadd.f32 %v1996_v29, %v1995_v21 }
 0x12a   : > { %v2090_v33 = vpop.f32.mrf.mxu1  ;;  %v2002_v50 = vpop.f32.mrf.mxu0 }
 0x12b   : > { %v2091_v15 = vadd.f32 %v2090_v33, %v2089_v28  ;;  %2208 = vmatprep.mubr.bf16.mxu0 %v1208_v32  ;;  %v1180_v43 = vmax.f32 %v1072_v11, 0.0  ;;  %v935_v33 = vadd.f32 %v1994_v53, %v2648_v17  ;;  %v938_v19 = vadd.f32 %v1997_v25, %v2648_v17 }
 0x12c   : > { %v2092_v23 = vpop.f32.mrf.mxu1  ;;  %v2004_v57 = vpop.f32.mrf.mxu0  ;;  %v2003_v29 = vadd.f32 %v2002_v50, %v2001_v40 }
 0x12d   : > { %v1075_v37 = vadd.f32 %v2091_v15, %v914_v30 }
 0x12e   : > { %v2093_v39 = vpop.f32.mrf.mxu1  ;;  %v2005_v41 = vpop.f32.mrf.mxu0 }
 0x12f   : > { %v1181_v44 = vmax.f32 %v1075_v37, 0.0  ;;  %v2094_v48 = vadd.f32 %v2093_v39, %v2092_v23  ;;  %v2006_v34 = vadd.f32 %v2005_v41, %v2004_v57 }
 0x130   : > { %v2095_v49 = vpop.f32.mrf.mxu1  ;;  %v2007_v0 = vpop.f32.mrf.mxu0 }
 0x131   : > { %v1209_v54 = vpack.c.bf16 %v1181_v44, %v1180_v43  ;;  %v1080_v59 = vadd.f32 %v2094_v48, %v919_v45 }
 0x132   : > { %v2096_v55 = vpop.f32.mrf.mxu1  ;;  %v2008_v14 = vpop.f32.mrf.mxu0 }
 0x133   : > { %v2097_v26 = vadd.f32 %v2096_v55, %v2095_v49  ;;  %2209 = vmatmul.mubr.bf16.gmra.mxu0 %v1209_v54  ;;  %v1182_v5 = vmax.f32 %v1080_v59, 0.0  ;;  %v946_v59 = vadd.f32 %v2003_v29, %v2648_v17  ;;  %v2009_v40 = vadd.f32 %v2008_v14, %v2007_v0 }
 0x134   : > { %v2098_v35 = vpop.f32.mrf.mxu1  ;;  %v2010_v20 = vpop.f32.mrf.mxu0 }
 0x135   : > { %v1083_v60 = vadd.f32 %v2097_v26, %v922_v52  ;;  %v943_v52 = vadd.f32 %v2000_v13, %v2648_v17 }
 0x136   : > { %v2099_v63 = vpop.f32.mrf.mxu1  ;;  %v2011_v3 = vpop.f32.mrf.mxu0 }
 0x137   : > { %v1183_v8 = vmax.f32 %v1083_v60, 0.0  ;;  %v2100_v1 = vadd.f32 %v2099_v63, %v2098_v35  ;;  %v2012_v57 = vadd.f32 %v2011_v3, %v2010_v20 }
 0x138   : > { %v2101_v4 = vpop.f32.mrf.mxu1  ;;  %v2013_v28 = vpop.f32.mrf.mxu0 }
 0x139   : > { %v1210_v16 = vpack.c.bf16 %v1183_v8, %v1182_v5  ;;  %v1088_v22 = vadd.f32 %v2100_v1, %v927_v10  ;;  %v951_v1 = vadd.f32 %v2006_v34, %v2648_v17 }
 0x13a   : > { %v2102_v18 = vpop.f32.mrf.mxu1  ;;  %v2014_v38 = vpop.f32.mrf.mxu0 }
 0x13b   : > { %v2103_v47 = vadd.f32 %v2102_v18, %v2101_v4  ;;  %2212 = vmatprep.mubr.bf16.mxu0 %v1210_v16  ;;  %v1184_v30 = vmax.f32 %v1088_v22, 0.0  ;;  %v954_v16 = vadd.f32 %v2009_v40, %v2648_v17  ;;  %v2015_v0 = vadd.f32 %v2014_v38, %v2013_v28 }
 0x13c   : > { %v2104_v58 = vpop.f32.mrf.mxu1  ;;  %v2016_v45 = vpop.f32.mrf.mxu0 }
 0x13d   : > { %v1091_v24 = vadd.f32 %v2103_v47, %v930_v6 }
 0x13e   : > { %v2105_v27 = vpop.f32.mrf.mxu1  ;;  %v2017_v35 = vpop.f32.mrf.mxu0 }
 0x13f   : > { %v1185_v32 = vmax.f32 %v1091_v24, 0.0  ;;  %v2106_v11 = vadd.f32 %v2105_v27, %v2104_v58  ;;  %v2018_v20 = vadd.f32 %v2017_v35, %v2016_v45 }
 0x140   : > { %v2107_v15 = vpop.f32.mrf.mxu1  ;;  %v2019_v5 = vpop.f32.mrf.mxu0 }
 0x141   : > { %v1211_v23 = vpack.c.bf16 %v1185_v32, %v1184_v30  ;;  %v1096_v39 = vadd.f32 %v2106_v11, %v935_v33  ;;  %v959_v32 = vadd.f32 %v2012_v57, %v2648_v17 }
 0x142   : > { %v2108_v37 = vpop.f32.mrf.mxu1  ;;  %v2020_v47 = vpop.f32.mrf.mxu0 }
 0x143   : > { %v2109_v43 = vadd.f32 %v2108_v37, %v2107_v15  ;;  %2213 = vmatmul.mubr.bf16.gmra.mxu0 %v1211_v23  ;;  %v1186_v48 = vmax.f32 %v1096_v39, 0.0  ;;  %v962_v15 = vadd.f32 %v2015_v0, %v2648_v17  ;;  %v2021_v28 = vadd.f32 %v2020_v47, %v2019_v5 }
 0x144   : > { %v2110_v9 = vpop.f32.mrf.mxu1  ;;  %v2022_v25 = vpop.f32.mrf.mxu0 }
 0x145   : > { %v1099_v21 = vadd.f32 %v2109_v43, %v938_v19 }
 0x146   : > { %v2111_v44 = vpop.f32.mrf.mxu1  ;;  %v2023_v37 = vpop.f32.mrf.mxu0 }
 0x147   : > { %v1187_v49 = vmax.f32 %v1099_v21, 0.0  ;;  %v2112_v54 = vadd.f32 %v2111_v44, %v2110_v9  ;;  %v967_v44 = vadd.f32 %v2018_v20, %v2648_v17  ;;  %v2024_v45 = vadd.f32 %v2023_v37, %v2022_v25 }
 0x148   : > { %v2113_v55 = vpop.f32.mrf.mxu1  ;;  %v2025_v9 = vpop.f32.mrf.mxu0  ;;  %v991_v37 = vadd.f32 %v2633_v51, %v2648_v17 }
 0x149   : > { %v1212_v26 = vpack.c.bf16 %v1187_v49, %v1186_v48  ;;  %v1104_v60 = vadd.f32 %v2112_v54, %v943_v52  ;;  %v970_v52 = vadd.f32 %v2021_v28, %v2648_v17  ;;  %v975_v40 = vadd.f32 %v2024_v45, %v2648_v17 }
 0x14a   : > { %v2114_v31 = vpop.f32.mrf.mxu1 }
 0x14b   : > { %v2115_v62 = vadd.f32 %v2114_v31, %v2113_v55  ;;  %2216 = vmatprep.mubr.bf16.mxu0 %v1212_v26  ;;  %v1188_v8 = vmax.f32 %v1104_v60, 0.0 }
 0x14c   : > { %v2116_v36 = vpop.f32.mrf.mxu1 }
 0x14d   : > { %v1107_v63 = vadd.f32 %v2115_v62, %v946_v59  ;;  %v2026_v59 = vpop.f32.mrf.mxu0 }
 0x14e   : > { %v2117_v50 = vpop.f32.mrf.mxu1  ;;  %v2027_v62 = vadd.f32 %v2026_v59, %v2025_v9 }
 0x14f   : > { %v1189_v10 = vmax.f32 %v1107_v63, 0.0  ;;  %v2118_v4 = vadd.f32 %v2117_v50, %v2116_v36 }
 0x150   : > { %v2119_v6 = vpop.f32.mrf.mxu1 }
 0x151   : > { %v1213_v18 = vpack.c.bf16 %v1189_v10, %v1188_v8  ;;  %v1112_v53 = vadd.f32 %v2118_v4, %v951_v1  ;;  %v978_v8 = vadd.f32 %v2027_v62, %v2648_v17 }
 0x152   : > { %v2120_v22 = vpop.f32.mrf.mxu1 }
 0x153   : > { %v2121_v58 = vadd.f32 %v2120_v22, %v2119_v6  ;;  %2217 = vmatmul.mubr.bf16.gmra.mxu0 %v1213_v18  ;;  %v1190_v27 = vmax.f32 %v1112_v53, 0.0 }
 0x154   : > { %v2122_v41 = vpop.f32.mrf.mxu1 }
 0x155   : > { %v1115_v24 = vadd.f32 %v2121_v58, %v954_v16 }
 0x156   : > { %v2123_v14 = vpop.f32.mrf.mxu1 }
 0x157   : > { %v1191_v30 = vmax.f32 %v1115_v24, 0.0  ;;  %v2124_v33 = vadd.f32 %v2123_v14, %v2122_v41  ;;  %v983_v41 = vadd.f32 %v2629_v42, %v2648_v17  ;;  %v986_v14 = vadd.f32 %v2631_v46, %v2648_v17 }
 0x158   : > { %v2125_v11 = vpop.f32.mrf.mxu1 }
 0x159   : > { %v1214_v19 = vpack.c.bf16 %v1191_v30, %v1190_v27  ;;  %v1120_v39 = vadd.f32 %v2124_v33, %v959_v32 }
 0x15a   : > { %v2126_v23 = vpop.f32.mrf.mxu1 }
 0x15b   : > { %v2127_v43 = vadd.f32 %v2126_v23, %v2125_v11  ;;  %2220 = vmatprep.mubr.bf16.mxu0 %v1214_v19  ;;  %v1192_v21 = vmax.f32 %v1120_v39, 0.0 }
 0x15c   : > { %v2128_v3 = vpop.f32.mrf.mxu1 }
 0x15d   : > { %v1123_v13 = vadd.f32 %v2127_v43, %v962_v15  ;;  %v994_v43 = vadd.f32 %v2635_v56, %v2648_v17 }
 0x15e   : > { %v2129_v38 = vpop.f32.mrf.mxu1 }
 0x15f   : > { %v1193_v29 = vmax.f32 %v1123_v13, 0.0  ;;  %v2130_v48 = vadd.f32 %v2129_v38, %v2128_v3 }
 0x160   : > { %v2131_v49 = vpop.f32.mrf.mxu1 }
 0x161   : > { %v1215_v54 = vpack.c.bf16 %v1193_v29, %v1192_v21  ;;  %v1128_v26 = vadd.f32 %v2130_v48, %v967_v44  ;;  %v999_v44 = vadd.f32 %v2637_v61, %v2648_v17 }
 0x162   : > { %v2132_v55 = vpop.f32.mrf.mxu1 }
 0x163   : > { %v2133_v31 = vadd.f32 %v2132_v55, %v2131_v49  ;;  %2221 = vmatmul.mubr.bf16.gmra.mxu0 %v1215_v54  ;;  %v1194_v36 = vmax.f32 %v1128_v26, 0.0  ;;  %v1002_v49 = vadd.f32 %v2639_v2, %v2648_v17 }
 0x164   : > { %v2134_v35 = vpop.f32.mrf.mxu1 }
 0x165   : > { %v1131_v60 = vadd.f32 %v2133_v31, %v970_v52 }
 0x166   : > { %v2135_v34 = vpop.f32.mrf.mxu1 }
 0x167   : > { %v1195_v63 = vmax.f32 %v1131_v60, 0.0  ;;  %v2136_v50 = vadd.f32 %v2135_v34, %v2134_v35  ;;  %v1007_v60 = vadd.f32 %v2641_v7, %v2648_v17  ;;  %v1010_v34 = vadd.f32 %v2643_v12, %v2648_v17 }
 0x168   : > { %v2137_v5 = vpop.f32.mrf.mxu1 }
 0x169   : > { %v1216_v10 = vpack.c.bf16 %v1195_v63, %v1194_v36  ;;  %v1136_v4 = vadd.f32 %v2136_v50, %v975_v40 }
 0x16a   : > { %v2138_v1 = vpop.f32.mrf.mxu1 }
 0x16b   : > { %v2139_v6 = vadd.f32 %v2138_v1, %v2137_v5  ;;  %2224 = vmatprep.mubr.bf16.mxu0 %v1216_v10  ;;  %v1196_v47 = vmax.f32 %v1136_v4, 0.0 }
 0x16c   : > { %v2140_v16 = vpop.f32.mrf.mxu1 }
 0x16d   : > { %v1139_v18 = vadd.f32 %v2139_v6, %v978_v8 }
 0x16e   : > { %v2141_v22 = vpop.f32.mrf.mxu1 }
 0x16f   : > { %v1197_v53 = vmax.f32 %v1139_v18, 0.0  ;;  %v2142_v58 = vadd.f32 %v2141_v22, %v2140_v16 }
 0x170   : > { %v2143_v57 = vpop.f32.mrf.mxu1 }
 0x171   : > { %v1217_v24 = vpack.c.bf16 %v1197_v53, %v1196_v47  ;;  %v1144_v25 = vadd.f32 %v2142_v58, %v983_v41 }
 0x172   : > { %v2144_v0 = vpop.f32.mrf.mxu1 }
 0x173   : > { %v2145_v27 = vadd.f32 %v2144_v0, %v2143_v57  ;;  %2225 = vmatmul.mubr.bf16.gmra.mxu0 %v1217_v24  ;;  %v1198_v11 = vmax.f32 %v1144_v25, 0.0 }
 0x174   : > { %v2146_v30 = vpop.f32.mrf.mxu1 }
 0x175   : > { %v1147_v32 = vadd.f32 %v2145_v27, %v986_v14 }
 0x176   : > { %v2147_v33 = vpop.f32.mrf.mxu1 }
 0x177   : > { %v1199_v15 = vmax.f32 %v1147_v32, 0.0  ;;  %v2148_v19 = vadd.f32 %v2147_v33, %v2146_v30 }
 0x178   : > { %v2149_v23 = vpop.f32.mrf.mxu1 }
 0x179   : > { %v1218_v39 = vpack.c.bf16 %v1199_v15, %v1198_v11  ;;  %v1152_v20 = vadd.f32 %v2148_v19, %v991_v37 }
 0x17a   : > { %v2150_v42 = vpop.f32.mrf.mxu1 }
 0x17b   : > { %v2151_v46 = vadd.f32 %v2150_v42, %v2149_v23  ;;  %2228 = vmatprep.mubr.bf16.mxu0 %v1218_v39  ;;  %v1200_v38 = vmax.f32 %v1152_v20, 0.0 }
 0x17c   : > { %v2152_v3 = vpop.f32.mrf.mxu1 }
 0x17d   : > { %v1155_v13 = vadd.f32 %v2151_v46, %v994_v43 }
 0x17e   : > { %v2153_v28 = vpop.f32.mrf.mxu1 }
 0x17f   : > { %v1201_v9 = vmax.f32 %v1155_v13, 0.0  ;;  %v2154_v21 = vadd.f32 %v2153_v28, %v2152_v3 }
 0x180   : > { %v2155_v29 = vpop.f32.mrf.mxu1 }
 0x181   : > { %v1219_v48 = vpack.c.bf16 %v1201_v9, %v1200_v38  ;;  %v1160_v52 = vadd.f32 %v2154_v21, %v999_v44 }
 0x182   : > { %v2156_v51 = vpop.f32.mrf.mxu1 }
 0x183   : > { %v2157_v56 = vadd.f32 %v2156_v51, %v2155_v29  ;;  %2229 = vmatmul.mubr.bf16.gmra.mxu0 %v1219_v48  ;;  %v1202_v26 = vmax.f32 %v1160_v52, 0.0 }
 0x184   : > { %v2158_v54 = vpop.f32.mrf.mxu1 }
 0x185   : > { %v1163_v55 = vadd.f32 %v2157_v56, %v1002_v49 }
 0x186   : > { %v2159_v59 = vpop.f32.mrf.mxu1 }
 0x187   : > { %v1203_v31 = vmax.f32 %v1163_v55, 0.0  ;;  %v2160_v45 = vadd.f32 %v2159_v59, %v2158_v54 }
 0x188   : > { %v2161_v35 = vpop.f32.mrf.mxu1 }
 0x189   : > { %v1220_v61 = vpack.c.bf16 %v1203_v31, %v1202_v26  ;;  %v1168_v2 = vadd.f32 %v2160_v45, %v1007_v60 }
 0x18a   : > { %v2162_v62 = vpop.f32.mrf.mxu1 }
 0x18b   : > { %v2163_v36 = vadd.f32 %v2162_v62, %v2161_v35  ;;  %2232 = vmatprep.mubr.bf16.mxu0 %v1220_v61  ;;  %v1204_v40 = vmax.f32 %v1168_v2, 0.0 }
 0x18d   : > { %v1171_v63 = vadd.f32 %v2163_v36, %v1010_v34 }
 0x18f   : > { %v1205_v50 = vmax.f32 %v1171_v63, 0.0 }
 0x191   : > { %v1221_v5 = vpack.c.bf16 %v1205_v50, %v1204_v40 }
 0x193   : > { %2233 = vmatmul.mubr.bf16.gmra.mxu0 %v1221_v5 }
 0x1e3   : > { %v2206_v8 = vpop.f32.mrf.mxu0 }
 0x1e5   : > { %v1320_v10 = vpop.f32.mrf.mxu0 }
 0x1e7   : > { %v2207_v7 = vpop.f32.mrf.mxu0 }
 0x1e8   : > { %v1853_v12 = vpack.c.bf16 %v2207_v7, %v2206_v8 }
 0x1e9   : > { %v1323_v17 = vpop.f32.mrf.mxu0 }
 0x1ea   : > { %1925 = vst [vmem:[%s2706_s10 + $0x8] sm:$0xff] %v1853_v12   ;;  %v1848_v1 = vpack.c.bf16 %v1323_v17, %v1320_v10 }
 0x1ec   : > { %1849 = vst [vmem:[%s2706_s10] sm:$0xff] %v1848_v1  }
 0x1f3   : > { %v2210_v4 = vpop.f32.mrf.mxu0 }
 0x1f5   : > { %v1336_v6 = vpop.f32.mrf.mxu0 }
 0x1f7   : > { %v2211_v16 = vpop.f32.mrf.mxu0 }
 0x1f8   : > { %v1863_v18 = vpack.c.bf16 %v2211_v16, %v2210_v4 }
 0x1f9   : > { %v1339_v22 = vpop.f32.mrf.mxu0 }
 0x1fa   : > { %1927 = vst [vmem:[%s2706_s10 + $0x18] sm:$0xff] %v1863_v18   ;;  %v1858_v47 = vpack.c.bf16 %v1339_v22, %v1336_v6 }
 0x1fc   : > { %1926 = vst [vmem:[%s2706_s10 + $0x10] sm:$0xff] %v1858_v47  }
 0x203   : > { %v2214_v53 = vpop.f32.mrf.mxu0 }
 0x205   : > { %v1352_v58 = vpop.f32.mrf.mxu0 }
 0x207   : > { %v2215_v57 = vpop.f32.mrf.mxu0 }
 0x208   : > { %v1873_v41 = vpack.c.bf16 %v2215_v57, %v2214_v53 }
 0x209   : > { %v1355_v24 = vpop.f32.mrf.mxu0 }
 0x20a   : > { %1929 = vst [vmem:[%s2706_s10 + $0x28] sm:$0xff] %v1873_v41   ;;  %v1868_v0 = vpack.c.bf16 %v1355_v24, %v1352_v58 }
 0x20c   : > { %1928 = vst [vmem:[%s2706_s10 + $0x20] sm:$0xff] %v1868_v0  }
 0x213   : > { %v2218_v14 = vpop.f32.mrf.mxu0 }
 0x215   : > { %v1368_v25 = vpop.f32.mrf.mxu0 }
 0x217   : > { %v2219_v27 = vpop.f32.mrf.mxu0 }
 0x218   : > { %v1883_v30 = vpack.c.bf16 %v2219_v27, %v2218_v14 }
 0x219   : > { %v1371_v32 = vpop.f32.mrf.mxu0 }
 0x21a   : > { %1931 = vst [vmem:[%s2706_s10 + $0x38] sm:$0xff] %v1883_v30   ;;  %v1878_v33 = vpack.c.bf16 %v1371_v32, %v1368_v25 }
 0x21c   : > { %1930 = vst [vmem:[%s2706_s10 + $0x30] sm:$0xff] %v1878_v33  }
 0x223   : > { %v2222_v11 = vpop.f32.mrf.mxu0 }
 0x225   : > { %v1384_v15 = vpop.f32.mrf.mxu0 }
 0x227   : > { %v2223_v19 = vpop.f32.mrf.mxu0 }
 0x228   : > { %v1893_v23 = vpack.c.bf16 %v2223_v19, %v2222_v11 }
 0x229   : > { %v1387_v37 = vpop.f32.mrf.mxu0 }
 0x22a   : > { %1933 = vst [vmem:[%s2706_s10 + $0x48] sm:$0xff] %v1893_v23   ;;  %v1888_v39 = vpack.c.bf16 %v1387_v37, %v1384_v15 }
 0x22c   : > { %1932 = vst [vmem:[%s2706_s10 + $0x40] sm:$0xff] %v1888_v39  }
 0x233   : > { %v2226_v42 = vpop.f32.mrf.mxu0 }
 0x235   : > { %v1400_v43 = vpop.f32.mrf.mxu0 }
 0x237   : > { %v2227_v20 = vpop.f32.mrf.mxu0 }
 0x238   : > { %v1903_v46 = vpack.c.bf16 %v2227_v20, %v2226_v42 }
 0x239   : > { %v1403_v3 = vpop.f32.mrf.mxu0 }
 0x23a   : > { %1935 = vst [vmem:[%s2706_s10 + $0x58] sm:$0xff] %v1903_v46   ;;  %v1898_v13 = vpack.c.bf16 %v1403_v3, %v1400_v43 }
 0x23c   : > { %1934 = vst [vmem:[%s2706_s10 + $0x50] sm:$0xff] %v1898_v13  }
 0x243   : > { %v2230_v28 = vpop.f32.mrf.mxu0 }
 0x245   : > { %v1416_v38 = vpop.f32.mrf.mxu0 }
 0x247   : > { %v2231_v9 = vpop.f32.mrf.mxu0 }
 0x248   : > { %v1913_v21 = vpack.c.bf16 %v2231_v9, %v2230_v28 }
 0x249   : > { %v1419_v29 = vpop.f32.mrf.mxu0 }
 0x24a   : > { %1937 = vst [vmem:[%s2706_s10 + $0x68] sm:$0xff] %v1913_v21   ;;  %v1908_v44 = vpack.c.bf16 %v1419_v29, %v1416_v38 }
 0x24c   : > { %1936 = vst [vmem:[%s2706_s10 + $0x60] sm:$0xff] %v1908_v44  }
 0x253   : > { %v2234_v48 = vpop.f32.mrf.mxu0 }
 0x255   : > { %v1432_v51 = vpop.f32.mrf.mxu0 }
 0x257   : > { %v2235_v49 = vpop.f32.mrf.mxu0 }
 0x258   : > { %v1923_v52 = vpack.c.bf16 %v2235_v49, %v2234_v48 }
 0x259   : > { %v1435_v56 = vpop.f32.mrf.mxu0 }
 0x25a   : > { %1939 = vst [vmem:[%s2706_s10 + $0x78] sm:$0xff] %v1923_v52   ;;  %v1918_v54 = vpack.c.bf16 %v1435_v56, %v1432_v51 }
 0x25c   : > { %1938 = vst [vmem:[%s2706_s10 + $0x70] sm:$0xff] %v1918_v54  }
 0x25d PF: > { %s14_s15 = sadd.s32 1, %s2402_s15  }
 0x25e   : > { %p11_p4 = scmp.ge.s32.totalorder %s14_s15, 4  }
 0x260   :  { %13 = sbr.rel (!%p11_p4) target bundleno = 1 (0x1), region = 66 }

</bundles_post_ra>
